<compile_context>
chip_gen: v5e
topology: v5e:2x2
jax: 0.10.0
libtpu: 0.0.40
codegen_flags: <defaults>
</compile_context>

<pallas_src>
import functools

import jax
import jax.numpy as jnp
from jax import lax
from jax.experimental import pallas as pl
from jax.experimental.pallas import tpu as pltpu

NB_ACTIONS = 4
HIDDEN = 128
K_RAW = 9248          # 32 * 17 * 17 (NHWC flatten of the conv2 output)


# ----------------------------------------------------------------------------
# Pallas kernel: hidden Linear + ReLU + fused value/policy heads + softmax
# ----------------------------------------------------------------------------
def _fc_tail_kernel(x_ref, wh_ref, bh_ref, whd_ref, bhd_ref, out_ref, *,
                    nb_actions):
    # Hidden Linear(9248 -> 128) on the MXU: bf16 operands, f32 accumulation.
    x = x_ref[...].astype(jnp.bfloat16)                           # (B, 9248)
    h = jnp.dot(x, wh_ref[...], preferred_element_type=jnp.float32)
    h = jnp.maximum(h + bh_ref[...], 0.0)                         # ReLU (B,128)

    # Fused heads: col 0 = value, cols 1..A = policy logits, rest zero.
    y = jnp.dot(h.astype(jnp.bfloat16), whd_ref[...],
                preferred_element_type=jnp.float32)
    y = y + bhd_ref[...]                                          # (B, 128)

    col = lax.broadcasted_iota(jnp.int32, y.shape, 1)
    is_pol = jnp.logical_and(col >= 1, col < 1 + nb_actions)
    masked = jnp.where(is_pol, y, jnp.float32(-1e30))
    m = jnp.max(masked, axis=-1, keepdims=True)
    e = jnp.exp(masked - m)                                       # 0 off-policy
    inv = pl.reciprocal(jnp.sum(e, axis=-1, keepdims=True), approx=True)
    probs = e * inv
    # Lane-dense output slab: [value | softmax(policy) | zeros]
    out_ref[...] = jnp.where(col == 0, y, probs).astype(out_ref.dtype)


def fc_tail(flat, wh, bh, w_heads, b_heads, *, nb_actions):
    """flat: (B, 9248) f32.  Returns (B, 128) slab [value | policy | 0]."""
    B = flat.shape[0]
    kernel = functools.partial(_fc_tail_kernel, nb_actions=nb_actions)
    vmem = pl.BlockSpec(memory_space=pltpu.MemorySpace.VMEM)
    return pl.pallas_call(
        kernel,
        out_shape=jax.ShapeDtypeStruct((B, HIDDEN), jnp.float32),
        in_specs=[vmem, vmem, vmem, vmem, vmem],
        out_specs=vmem,
    )(flat, wh, bh, w_heads, b_heads)


# ----------------------------------------------------------------------------
# Parameters: PyTorch-native layout -> one-time kernel layout
# ----------------------------------------------------------------------------
def init_torch_params(key, nb_actions=NB_ACTIONS):
    """Parameters in the layouts nn.Module would hold them."""
    def uniform(k, shape, fan_in):
        bound = 1.0 / jnp.sqrt(jnp.float32(fan_in))
        return jax.random.uniform(k, shape, jnp.float32, -bound, bound)

    ks = jax.random.split(key, 10)
    return {
        "conv1.w": uniform(ks[0], (16, 1, 8, 8), 1 * 8 * 8),
        "conv1.b": uniform(ks[1], (16,), 1 * 8 * 8),
        "conv2.w": uniform(ks[2], (32, 16, 4, 4), 16 * 4 * 4),
        "conv2.b": uniform(ks[3], (32,), 16 * 4 * 4),
        "hidden.w": uniform(ks[4], (HIDDEN, K_RAW), K_RAW),
        "hidden.b": uniform(ks[5], (HIDDEN,), K_RAW),
        "value.w": uniform(ks[6], (1, HIDDEN), HIDDEN),
        "value.b": uniform(ks[7], (1,), HIDDEN),
        "policy.w": uniform(ks[8], (nb_actions, HIDDEN), HIDDEN),
        "policy.b": uniform(ks[9], (nb_actions,), HIDDEN),
    }


def prepare_params(pt, nb_actions=NB_ACTIONS):
    """One-time (outside jit) conversion to kernel layout; preserves PyTorch
    forward semantics (modulo bf16 weight storage).  Nothing here runs per
    forward call."""
    # Conv filters OIHW -> HWIO (activations are NHWC after conv1).
    w1 = jnp.transpose(pt["conv1.w"], (2, 3, 1, 0))                # (8,8,1,16)
    w2 = jnp.transpose(pt["conv2.w"], (2, 3, 1, 0))                # (4,4,16,32)
    # Hidden weight: PyTorch consumes an NCHW flatten (c,h,w); our activations
    # flatten in NHWC order (h,w,c).  Permute the 9248 input rows once, store
    # as (K,128) bf16 (halves the weight DMA; MXU accumulates in f32).
    wh = pt["hidden.w"].reshape(HIDDEN, 32, 17, 17)                # (out,c,h,w)
    wh = jnp.transpose(wh, (2, 3, 1, 0)).reshape(K_RAW, HIDDEN)    # (h*w*c,out)
    wh = wh.astype(jnp.bfloat16)
    bh = pt["hidden.b"].reshape(1, HIDDEN)
    # Heads packed lane-dense: col 0 = value, cols 1..A = policy, rest zero.
    w_heads = jnp.zeros((HIDDEN, HIDDEN), jnp.float32)
    w_heads = w_heads.at[:, 0].set(pt["value.w"][0])
    w_heads = w_heads.at[:, 1:1 + nb_actions].set(pt["policy.w"].T)
    w_heads = w_heads.astype(jnp.bfloat16)
    b_heads = jnp.zeros((1, HIDDEN), jnp.float32)
    b_heads = b_heads.at[0, 0].set(pt["value.b"][0])
    b_heads = b_heads.at[0, 1:1 + nb_actions].set(pt["policy.b"])
    return {
        "w1": w1, "b1": pt["conv1.b"],
        "w2": w2, "b2": pt["conv2.b"],
        "wh": wh, "bh": bh,
        "w_heads": w_heads, "b_heads": b_heads,
    }


# ----------------------------------------------------------------------------
# Forward
# ----------------------------------------------------------------------------
def _conv(x, w, stride, dims):
    dn = lax.conv_dimension_numbers(x.shape, w.shape, dims)
    return lax.conv_general_dilated(x, w, (stride, stride), "VALID",
                                    dimension_numbers=dn)


def forward(kp, x_nchw, nb_actions=NB_ACTIONS):
    B = x_nchw.shape[0]
    # conv1 consumes NCHW directly and emits NHWC: no explicit transpose op.
    y1 = jnp.maximum(
        _conv(x_nchw, kp["w1"], 2, ("NCHW", "HWIO", "NHWC")) + kp["b1"], 0.0)
    y2 = jnp.maximum(
        _conv(y1, kp["w2"], 2, ("NHWC", "HWIO", "NHWC")) + kp["b2"], 0.0)
    flat = y2.reshape(B, K_RAW)                                   # NHWC flatten
    out = fc_tail(flat, kp["wh"], kp["bh"], kp["w_heads"], kp["b_heads"],
                  nb_actions=nb_actions)                          # (B, 128)
    value = out[:, 0:1]
    policy = out[:, 1:1 + nb_actions]
    return policy, value


if __name__ == "__main__":
    # Input spatial size is dictated by Linear(9248,128): 9248 = 32*17*17
    # => conv2 out 17x17 => conv1 out 36x36 => input 78x78, 1 channel.
    B = 2
    x = jax.random.normal(jax.random.PRNGKey(0), (B, 1, 78, 78), jnp.float32)

    pt_params = init_torch_params(jax.random.PRNGKey(42), NB_ACTIONS)
    kp = prepare_params(pt_params, NB_ACTIONS)        # one-time, outside jit

    fwd = jax.jit(functools.partial(forward, nb_actions=NB_ACTIONS))
    policy, value = fwd(kp, x)
    jax.block_until_ready((policy, value))

    assert policy.shape == (B, NB_ACTIONS) and value.shape == (B, 1)
    assert bool(jnp.all(jnp.isfinite(policy))) and bool(jnp.all(jnp.isfinite(value)))
    # Softmax rows sum to ~1 (approx EUP reciprocal => loose tolerance).
    assert jnp.allclose(jnp.sum(policy, axis=1), 1.0, atol=2e-3)
    print("KERNEL_OK")
</pallas_src>

<mosaic_0001>
module attributes {stable_mosaic.version = 11 : i64} {
  func.func @_fc_tail_kernel(%arg0: memref<2x9248xf32, #tpu.memory_space<vmem>>, %arg1: memref<9248x128xbf16, #tpu.memory_space<vmem>>, %arg2: memref<1x128xf32, #tpu.memory_space<vmem>>, %arg3: memref<128x128xbf16, #tpu.memory_space<vmem>>, %arg4: memref<1x128xf32, #tpu.memory_space<vmem>>, %arg5: memref<2x128xf32, #tpu.memory_space<vmem>>) attributes {dimension_semantics = [], scalar_prefetch = 0 : i64, scratch_operands = 0 : i64, tpu.core_type = #tpu.core_type<tc>} {
    %c0 = arith.constant 0 : index
    %c0_0 = arith.constant 0 : index
    %0 = vector.load %arg0[%c0, %c0_0] : memref<2x9248xf32, #tpu.memory_space<vmem>>, vector<2x9248xf32>
    %1 = arith.truncf %0 : vector<2x9248xf32> to vector<2x9248xbf16>
    %c0_1 = arith.constant 0 : index
    %c0_2 = arith.constant 0 : index
    %2 = vector.load %arg1[%c0_1, %c0_2] : memref<9248x128xbf16, #tpu.memory_space<vmem>>, vector<9248x128xbf16>
    %cst = arith.constant dense<0.000000e+00> : vector<2x128xf32>
    %3 = tpu.matmul %1, %2, %cst {dimension_numbers = #tpu.dot_dimension_numbers<[1], [0], [0], [1], [0, 0, 1, 1], [], []>} : vector<2x9248xbf16>, vector<9248x128xbf16>, vector<2x128xf32> -> vector<2x128xf32>
    %c0_3 = arith.constant 0 : index
    %c0_4 = arith.constant 0 : index
    %4 = vector.load %arg2[%c0_3, %c0_4] : memref<1x128xf32, #tpu.memory_space<vmem>>, vector<1x128xf32>
    %5 = vector.broadcast %4 : vector<1x128xf32> to vector<2x128xf32>
    %6 = arith.addf %3, %5 : vector<2x128xf32>
    %cst_5 = arith.constant 0.000000e+00 : f32
    %7 = vector.broadcast %cst_5 : f32 to vector<2x128xf32>
    %8 = arith.maximumf %6, %7 : vector<2x128xf32>
    %9 = arith.truncf %8 : vector<2x128xf32> to vector<2x128xbf16>
    %c0_6 = arith.constant 0 : index
    %c0_7 = arith.constant 0 : index
    %10 = vector.load %arg3[%c0_6, %c0_7] : memref<128x128xbf16, #tpu.memory_space<vmem>>, vector<128x128xbf16>
    %cst_8 = arith.constant dense<0.000000e+00> : vector<2x128xf32>
    %11 = tpu.matmul %9, %10, %cst_8 {dimension_numbers = #tpu.dot_dimension_numbers<[1], [0], [0], [1], [0, 0, 1, 1], [], []>} : vector<2x128xbf16>, vector<128x128xbf16>, vector<2x128xf32> -> vector<2x128xf32>
    %c0_9 = arith.constant 0 : index
    %c0_10 = arith.constant 0 : index
    %12 = vector.load %arg4[%c0_9, %c0_10] : memref<1x128xf32, #tpu.memory_space<vmem>>, vector<1x128xf32>
    %13 = vector.broadcast %12 : vector<1x128xf32> to vector<2x128xf32>
    %14 = arith.addf %11, %13 : vector<2x128xf32>
    %15 = tpu.iota {dimensions = array<i32: 1>} : vector<2x128xi32>
    %c1_i32 = arith.constant 1 : i32
    %16 = vector.broadcast %c1_i32 : i32 to vector<2x128xi32>
    %17 = arith.cmpi sge, %15, %16 : vector<2x128xi32>
    %c5_i32 = arith.constant 5 : i32
    %18 = vector.broadcast %c5_i32 : i32 to vector<2x128xi32>
    %19 = arith.cmpi slt, %15, %18 : vector<2x128xi32>
    %20 = arith.andi %17, %19 : vector<2x128xi1>
    %cst_11 = arith.constant -1.000000e+30 : f32
    %21 = vector.broadcast %cst_11 : f32 to vector<2x128xf32>
    %22 = arith.select %20, %14, %21 : vector<2x128xi1>, vector<2x128xf32>
    %cst_12 = arith.constant dense<0xFF800000> : vector<2xf32>
    %23 = vector.multi_reduction <maximumf>, %22, %cst_12 [1] : vector<2x128xf32> to vector<2xf32>
    %24 = vector.shape_cast %23 : vector<2xf32> to vector<2x1xf32>
    %25 = vector.broadcast %24 : vector<2x1xf32> to vector<2x128xf32>
    %26 = arith.subf %22, %25 : vector<2x128xf32>
    %27 = math.exp %26 : vector<2x128xf32>
    %cst_13 = arith.constant dense<0.000000e+00> : vector<2xf32>
    %28 = vector.multi_reduction <add>, %27, %cst_13 [1] : vector<2x128xf32> to vector<2xf32>
    %29 = vector.shape_cast %28 : vector<2xf32> to vector<2x1xf32>
    %30 = tpu.reciprocal %29 {approx = true} : vector<2x1xf32> -> vector<2x1xf32>
    %31 = vector.broadcast %30 : vector<2x1xf32> to vector<2x128xf32>
    %32 = arith.mulf %27, %31 : vector<2x128xf32>
    %c0_i32 = arith.constant 0 : i32
    %33 = vector.broadcast %c0_i32 : i32 to vector<2x128xi32>
    %34 = arith.cmpi eq, %15, %33 : vector<2x128xi32>
    %35 = arith.select %34, %14, %32 : vector<2x128xi1>, vector<2x128xf32>
    %c0_14 = arith.constant 0 : index
    %c0_15 = arith.constant 0 : index
    %36 = vector.load %arg5[%c0_14, %c0_15] : memref<2x128xf32, #tpu.memory_space<vmem>>, vector<2x128xf32>
    tpu.vector_store %arg5[%c0_14, %c0_15], %35 {strides = array<i32>} : memref<2x128xf32, #tpu.memory_space<vmem>>, vector<2x128xf32>,
    return
  }
}

</mosaic_0001>

<bundles_post_ra>
// kernel: forward.1
= control target key start
LH: loop header
LB: loop body
LE: loop exit
PB: predicated region body
PF: predicated region fallthrough
CT: control target
= control target key end

     0   :  { %vm4926_vm0 = vcmask 261120   ;;  %vm5968_vm4 = vcmask 1041408   ;;  %s10939_s1 = inlined_call_operand.vmem [shape: bf16[9248,128], index: 1, kind: input, shape index: {}]   ;;  %s10940_s0 = inlined_call_operand.vmem [shape: f32[2,9248], index: 0, kind: input, shape index: {}]   ;;  %s10941_s2 = inlined_call_operand.vmem [shape: f32[1,128], index: 2, kind: input, shape index: {}]   ;;  %s10942_s4 = inlined_call_operand.vmem [shape: f32[1,128], index: 4, kind: input, shape index: {}]   ;;  %s10943_s3 = inlined_call_operand.vmem [shape: bf16[128,128], index: 3, kind: input, shape index: {}]   ;;  %s10944_s5 = inlined_call_operand.vmem [shape: f32[2,128], index: 5, kind: output, shape index: {}]  }
   0x1   :  { %v8339_v0 = vld [vmem:[%s10939_s1 + $0x38] sm:$0xff]  ;;  %v8338_v4 = vld [vmem:[%s10939_s1 + $0x30] sm:$0xff]  ;;  %v8337_v8 = vld [vmem:[%s10939_s1 + $0x28] sm:$0xff] }
   0x2   :  { %v8355_v1 = vld [vmem:[%s10939_s1 + $0xb8] sm:$0xff]  ;;  %4930 = vmatpush.bf16.msra.mxu0 %v8339_v0  ;;  %v8354_v5 = vld [vmem:[%s10939_s1 + $0xb0] sm:$0xff]  ;;  %v8353_v9 = vld [vmem:[%s10939_s1 + $0xa8] sm:$0xff] }
   0x3   :  { %v8363_v2 = vld [vmem:[%s10939_s1 + $0xf8] sm:$0xff]  ;;  %4956 = vmatpush.bf16.msra.mxu2 %v8355_v1  ;;  %v8362_v6 = vld [vmem:[%s10939_s1 + $0xf0] sm:$0xff]  ;;  %v8361_v10 = vld [vmem:[%s10939_s1 + $0xe8] sm:$0xff] }
   0x4   :  { %v8347_v3 = vld [vmem:[%s10939_s1 + $0x78] sm:$0xff]  ;;  %4969 = vmatpush.bf16.msra.mxu3 %v8363_v2  ;;  %v8346_v7 = vld [vmem:[%s10939_s1 + $0x70] sm:$0xff]  ;;  %v8345_v11 = vld [vmem:[%s10939_s1 + $0x68] sm:$0xff] }
   0x5   :  { %4943 = vmatpush.bf16.msra.mxu1 %v8347_v3  ;;  %v8336_v12 = vld [vmem:[%s10939_s1 + $0x20] sm:$0xff]  ;;  %v8335_v16 = vld [vmem:[%s10939_s1 + $0x18] sm:$0xff]  ;;  %v8334_v21 = vld [vmem:[%s10939_s1 + $0x10] sm:$0xff] }
   0x6   :  { %4931 = vmatpush.bf16.msra.mxu0 %v8338_v4  ;;  %v8352_v13 = vld [vmem:[%s10939_s1 + $0xa0] sm:$0xff]  ;;  %v8351_v17 = vld [vmem:[%s10939_s1 + $0x98] sm:$0xff]  ;;  %v8350_v22 = vld [vmem:[%s10939_s1 + $0x90] sm:$0xff] }
   0x7   :  { %4957 = vmatpush.bf16.msra.mxu2 %v8354_v5  ;;  %v8360_v14 = vld [vmem:[%s10939_s1 + $0xe0] sm:$0xff]  ;;  %v8359_v18 = vld [vmem:[%s10939_s1 + $0xd8] sm:$0xff]  ;;  %v8358_v23 = vld [vmem:[%s10939_s1 + $0xd0] sm:$0xff] }
   0x8   :  { %4970 = vmatpush.bf16.msra.mxu3 %v8362_v6  ;;  %v8344_v15 = vld [vmem:[%s10939_s1 + $0x60] sm:$0xff]  ;;  %v8343_v19 = vld [vmem:[%s10939_s1 + $0x58] sm:$0xff]  ;;  %v8342_v24 = vld [vmem:[%s10939_s1 + $0x50] sm:$0xff] }
   0x9   :  { %4944 = vmatpush.bf16.msra.mxu1 %v8346_v7  ;;  %v21_v20 = vld [vmem:[%s10940_s0] sm:$0xff]  ;;  %v8333_v25 = vld [vmem:[%s10939_s1 + $0x8] sm:$0xff]  ;;  %v23_v31 = vld [vmem:[%s10940_s0 + $0x10] sm:$0xff] }
   0xa   :  { %4932 = vmatpush.bf16.msra.mxu0 %v8337_v8  ;;  %59 = vst [vmem:[#allocation1] ss:$4 sm:$0xff] %v21_v20  ;;  %v8349_v26 = vld [vmem:[%s10939_s1 + $0x88] sm:$0xff]  ;;  %v8332_v29 = vld [vmem:[%s10939_s1] sm:$0xff]  ;;  %v8371_v37 = vld [vmem:[%s10939_s1 + $0x138] sm:$0xff] }
   0xb   :  { %4958 = vmatpush.bf16.msra.mxu2 %v8353_v9  ;;  %v8357_v27 = vld [vmem:[%s10939_s1 + $0xc8] sm:$0xff]  ;;  %v8348_v30 = vld [vmem:[%s10939_s1 + $0x80] sm:$0xff]  ;;  %v8387_v38 = vld [vmem:[%s10939_s1 + $0x1b8] sm:$0xff] }
   0xc   :  { %4971 = vmatpush.bf16.msra.mxu3 %v8361_v10  ;;  %v8341_v28 = vld [vmem:[%s10939_s1 + $0x48] sm:$0xff]  ;;  %v8356_v36 = vld [vmem:[%s10939_s1 + $0xc0] sm:$0xff]  ;;  %v8395_v39 = vld [vmem:[%s10939_s1 + $0x1f8] sm:$0xff] }
   0xd   :  { %4945 = vmatpush.bf16.msra.mxu1 %v8345_v11  ;;  %v8340_v40 = vld [vmem:[%s10939_s1 + $0x40] sm:$0xff]  ;;  %v22_v42 = vld [vmem:[%s10940_s0 + $0x8] sm:$0xff]  ;;  %v8379_v43 = vld [vmem:[%s10939_s1 + $0x178] sm:$0xff] }
   0xe   :  { %4933 = vmatpush.bf16.msra.mxu0 %v8336_v12  ;;  %61 = vst [vmem:[#allocation1 + $0x20] ss:$4 sm:$0xff] %v22_v42  ;;  %v8370_v45 = vld [vmem:[%s10939_s1 + $0x130] sm:$0xff]  ;;  %v8369_v51 = vld [vmem:[%s10939_s1 + $0x128] sm:$0xff]  ;;  %v8368_v56 = vld [vmem:[%s10939_s1 + $0x120] sm:$0xff] }
   0xf   :  { %4959 = vmatpush.bf16.msra.mxu2 %v8352_v13  ;;  %v8386_v47 = vld [vmem:[%s10939_s1 + $0x1b0] sm:$0xff]  ;;  %v8385_v52 = vld [vmem:[%s10939_s1 + $0x1a8] sm:$0xff]  ;;  %v24_v58 = vld [vmem:[%s10940_s0 + $0x18] sm:$0xff] }
  0x10   :  { %4972 = vmatpush.bf16.msra.mxu3 %v8360_v14  ;;  %v8394_v48 = vld [vmem:[%s10939_s1 + $0x1f0] sm:$0xff]  ;;  %v8393_v53 = vld [vmem:[%s10939_s1 + $0x1e8] sm:$0xff]  ;;  %v8384_v61 = vld [vmem:[%s10939_s1 + $0x1a0] sm:$0xff] }
  0x11   :  { %4946 = vmatpush.bf16.msra.mxu1 %v8344_v15  ;;  %v64_v32 = vld.sshfl [vmem:[#allocation1 + $0x10] sm:$0xff pattern:$0x73625140]  ;;  %v62_v33 = vld.sshfl [vmem:[#allocation1] sm:$0xff pattern:$0x73625140] }
  0x12   :  { %4934 = vmatpush.bf16.msra.mxu0 %v8335_v16  ;;  %v65_v34 = vld.sshfl [vmem:[#allocation1 + $0x18] sm:$0xff pattern:$0x73625140]  ;;  %v63_v35 = vld.sshfl [vmem:[#allocation1 + $0x8] sm:$0xff pattern:$0x73625140]  ;;  %v227_v41 = vpack.c.bf16 %v64_v32, %v64_v32  ;;  %v225_v44 = vpack.c.bf16 %v62_v33, %v62_v33 }
  0x13   :  { %4960 = vmatpush.bf16.msra.mxu2 %v8351_v17  ;;  %70 = vst [vmem:[#allocation1] ss:$4 sm:$0xff] %v23_v31  ;;  %v228_v46 = vpack.c.bf16 %v65_v34, %v65_v34  ;;  %v226_v49 = vpack.c.bf16 %v63_v35, %v63_v35  ;;  %v8378_v50 = vld [vmem:[%s10939_s1 + $0x170] sm:$0xff]  ;;  %v8377_v54 = vld [vmem:[%s10939_s1 + $0x168] sm:$0xff]  ;;  %v8392_v62 = vld [vmem:[%s10939_s1 + $0x1e0] sm:$0xff] }
  0x14   :  { %4973 = vmatpush.bf16.msra.mxu3 %v8359_v18  ;;  %v8376_v63 = vld [vmem:[%s10939_s1 + $0x160] sm:$0xff]  ;;  %v8367_v0 = vld [vmem:[%s10939_s1 + $0x118] sm:$0xff]  ;;  %v8366_v4 = vld [vmem:[%s10939_s1 + $0x110] sm:$0xff] }
  0x15   :  { %4947 = vmatpush.bf16.msra.mxu1 %v8343_v19  ;;  %v9095_v55 = vld.sshfl [vmem:[#allocation1 + $0x30] sm:$0xff pattern:$0x73625140]  ;;  %v9100_v57 = vld.sshfl [vmem:[#allocation1 + $0x20] sm:$0xff pattern:$0x73625140] }
  0x16   :  { %4935 = vmatpush.bf16.msra.mxu0 %v8334_v21  ;;  %v9105_v59 = vld.sshfl [vmem:[#allocation1 + $0x38] sm:$0xff pattern:$0x73625140]  ;;  %v9107_v60 = vld.sshfl [vmem:[#allocation1 + $0x28] sm:$0xff pattern:$0x73625140]  ;;  %v231_v20 = vpack.c.bf16 %v9095_v55, %v9095_v55 }
  0x17   :  { %4961 = vmatpush.bf16.msra.mxu2 %v8350_v22  ;;  %71 = vst [vmem:[#allocation1 + $0x20] ss:$4 sm:$0xff] %v24_v58  ;;  %v8383_v1 = vld [vmem:[%s10939_s1 + $0x198] sm:$0xff]  ;;  %v8382_v5 = vld [vmem:[%s10939_s1 + $0x190] sm:$0xff]  ;;  %v8365_v8 = vld [vmem:[%s10939_s1 + $0x108] sm:$0xff]  ;;  %v229_v22 = vpack.c.bf16 %v9100_v57, %v9100_v57 }
  0x18   :  { %4974 = vmatpush.bf16.msra.mxu3 %v8358_v23  ;;  %v8391_v2 = vld [vmem:[%s10939_s1 + $0x1d8] sm:$0xff]  ;;  %v8390_v6 = vld [vmem:[%s10939_s1 + $0x1d0] sm:$0xff]  ;;  %v8381_v9 = vld [vmem:[%s10939_s1 + $0x188] sm:$0xff]  ;;  %v232_v23 = vpack.c.bf16 %v9105_v59, %v9105_v59 }
  0x19   :  { %4948 = vmatpush.bf16.msra.mxu1 %v8342_v24  ;;  %v8375_v3 = vld [vmem:[%s10939_s1 + $0x158] sm:$0xff]  ;;  %v8374_v7 = vld [vmem:[%s10939_s1 + $0x150] sm:$0xff]  ;;  %v8389_v10 = vld [vmem:[%s10939_s1 + $0x1c8] sm:$0xff] }
  0x1a   :  { %4936 = vmatpush.bf16.msra.mxu0 %v8333_v25  ;;  %v8373_v11 = vld [vmem:[%s10939_s1 + $0x148] sm:$0xff]  ;;  %v8364_v12 = vld [vmem:[%s10939_s1 + $0x100] sm:$0xff]  ;;  %v8403_v15 = vld [vmem:[%s10939_s1 + $0x238] sm:$0xff] }
  0x1b   :  { %4962 = vmatpush.bf16.msra.mxu2 %v8349_v26  ;;  %v8380_v13 = vld [vmem:[%s10939_s1 + $0x180] sm:$0xff]  ;;  %v8419_v16 = vld [vmem:[%s10939_s1 + $0x2b8] sm:$0xff]  ;;  %v8402_v21 = vld [vmem:[%s10939_s1 + $0x230] sm:$0xff] }
  0x1c   :  { %4975 = vmatpush.bf16.msra.mxu3 %v8357_v27  ;;  %v8388_v14 = vld [vmem:[%s10939_s1 + $0x1c0] sm:$0xff]  ;;  %v8427_v17 = vld [vmem:[%s10939_s1 + $0x2f8] sm:$0xff]  ;;  %v8418_v24 = vld [vmem:[%s10939_s1 + $0x2b0] sm:$0xff]  ;;  %v230_v27 = vpack.c.bf16 %v9107_v60, %v9107_v60 }
  0x1d   :  { %4949 = vmatpush.bf16.msra.mxu1 %v8341_v28  ;;  %v8372_v18 = vld [vmem:[%s10939_s1 + $0x140] sm:$0xff]  ;;  %v8411_v19 = vld [vmem:[%s10939_s1 + $0x278] sm:$0xff]  ;;  %v8426_v25 = vld [vmem:[%s10939_s1 + $0x2f0] sm:$0xff] }
  0x1e   :  { %4937 = vmatpush.bf16.msra.mxu0 %v8332_v29  ;;  %v9193_v26 = vld.sshfl [vmem:[#allocation1] sm:$0xff pattern:$0x73625140]  ;;  %v9197_v28 = vld.sshfl [vmem:[#allocation1 + $0x10] sm:$0xff pattern:$0x73625140] }
  0x1f   :  { %4963 = vmatpush.bf16.msra.mxu2 %v8348_v30  ;;  %v9199_v29 = vld.sshfl [vmem:[#allocation1 + $0x8] sm:$0xff pattern:$0x73625140]  ;;  %v8410_v30 = vld [vmem:[%s10939_s1 + $0x270] sm:$0xff]  ;;  %v25_v31 = vld [vmem:[%s10940_s0 + $0x20] sm:$0xff]  ;;  %v233_v60 = vpack.c.bf16 %v9193_v26, %v9193_v26 }
  0x20   :  { %4976 = vmatpush.bf16.msra.mxu3 %v8356_v36  ;;  %v9207_v32 = vld.sshfl [vmem:[#allocation1 + $0x18] sm:$0xff pattern:$0x73625140]  ;;  %v8401_v33 = vld [vmem:[%s10939_s1 + $0x228] sm:$0xff]  ;;  %v8420_v55 = vld [vmem:[%s10939_s1 + $0x2c0] sm:$0xff] }
  0x21   :  { %4950 = vmatpush.bf16.msra.mxu1 %v8340_v40  ;;  %4938 = vmatmul.bf16.vlgmr.msra.gmra.mxu0 %v225_v44  ;;  %80 = vst [vmem:[#allocation1] ss:$4 sm:$0xff] %v25_v31  ;;  %v8417_v34 = vld [vmem:[%s10939_s1 + $0x2a8] sm:$0xff]  ;;  %v8408_v40 = vld [vmem:[%s10939_s1 + $0x260] sm:$0xff]  ;;  %v8415_v42 = vld [vmem:[%s10939_s1 + $0x298] sm:$0xff] }
  0x22   :  { %4982 = vmatpush.bf16.msrb.mxu0 %v8371_v37  ;;  %4964 = vmatmul.bf16.vlgmr.msra.gmra.mxu2 %v227_v41  ;;  %v8425_v35 = vld [vmem:[%s10939_s1 + $0x2e8] sm:$0xff]  ;;  %v8400_v37 = vld [vmem:[%s10939_s1 + $0x220] sm:$0xff]  ;;  %v8399_v41 = vld [vmem:[%s10939_s1 + $0x218] sm:$0xff] }
  0x23   :  { %5008 = vmatpush.bf16.msrb.mxu2 %v8387_v38  ;;  %4977 = vmatmul.bf16.vlgmr.msra.gmra.mxu3 %v228_v46  ;;  %v8409_v36 = vld [vmem:[%s10939_s1 + $0x268] sm:$0xff]  ;;  %v8416_v38 = vld [vmem:[%s10939_s1 + $0x2a0] sm:$0xff]  ;;  %v8407_v44 = vld [vmem:[%s10939_s1 + $0x258] sm:$0xff] }
  0x24   :  { %5021 = vmatpush.bf16.msrb.mxu3 %v8395_v39  ;;  %4951 = vmatmul.bf16.vlgmr.msra.gmra.mxu1 %v226_v49  ;;  %v8424_v39 = vld [vmem:[%s10939_s1 + $0x2e0] sm:$0xff]  ;;  %v8414_v46 = vld [vmem:[%s10939_s1 + $0x290] sm:$0xff]  ;;  %v8397_v49 = vld [vmem:[%s10939_s1 + $0x208] sm:$0xff] }
  0x25   :  { %4995 = vmatpush.bf16.msrb.mxu1 %v8379_v43  ;;  %v8423_v43 = vld [vmem:[%s10939_s1 + $0x2d8] sm:$0xff]  ;;  %v8404_v59 = vld [vmem:[%s10939_s1 + $0x240] sm:$0xff]  ;;  %v8429_v26 = vld [vmem:[%s10939_s1 + $0x308] sm:$0xff] }
  0x26   :  { %4983 = vmatpush.bf16.msrb.mxu0 %v8370_v45  ;;  %v8398_v45 = vld [vmem:[%s10939_s1 + $0x210] sm:$0xff]  ;;  %v8451_v57 = vld [vmem:[%s10939_s1 + $0x3b8] sm:$0xff]  ;;  %v8444_v31 = vld [vmem:[%s10939_s1 + $0x380] sm:$0xff] }
  0x27   :  { %5009 = vmatpush.bf16.msrb.mxu2 %v8386_v47  ;;  %v8422_v47 = vld [vmem:[%s10939_s1 + $0x2d0] sm:$0xff]  ;;  %v8459_v58 = vld [vmem:[%s10939_s1 + $0x3f8] sm:$0xff] }
  0x28   :  { %5022 = vmatpush.bf16.msrb.mxu3 %v8394_v48  ;;  %v8406_v48 = vld [vmem:[%s10939_s1 + $0x250] sm:$0xff] }
  0x29   :  { %4996 = vmatpush.bf16.msrb.mxu1 %v8378_v50  ;;  %v8413_v50 = vld [vmem:[%s10939_s1 + $0x288] sm:$0xff] }
  0x2a   :  { %4984 = vmatpush.bf16.msrb.mxu0 %v8369_v51  ;;  %v8421_v51 = vld [vmem:[%s10939_s1 + $0x2c8] sm:$0xff] }
  0x2b   :  { %5010 = vmatpush.bf16.msrb.mxu2 %v8385_v52  ;;  %v8405_v52 = vld [vmem:[%s10939_s1 + $0x248] sm:$0xff] }
  0x2c   :  { %5023 = vmatpush.bf16.msrb.mxu3 %v8393_v53  ;;  %v8396_v53 = vld [vmem:[%s10939_s1 + $0x200] sm:$0xff] }
  0x2d   :  { %4997 = vmatpush.bf16.msrb.mxu1 %v8377_v54  ;;  %v8412_v54 = vld [vmem:[%s10939_s1 + $0x280] sm:$0xff] }
  0x2e   :  { %4985 = vmatpush.bf16.msrb.mxu0 %v8368_v56  ;;  %v8435_v56 = vld [vmem:[%s10939_s1 + $0x338] sm:$0xff] }
  0x2f   :  { %5011 = vmatpush.bf16.msrb.mxu2 %v8384_v61  ;;  %v235_v61 = vpack.c.bf16 %v9197_v28, %v9197_v28  ;;  %v8453_v28 = vld [vmem:[%s10939_s1 + $0x3c8] sm:$0xff] }
  0x30   :  { %5024 = vmatpush.bf16.msrb.mxu3 %v8392_v62  ;;  %v8443_v62 = vld [vmem:[%s10939_s1 + $0x378] sm:$0xff] }
  0x31   :  { %4998 = vmatpush.bf16.msrb.mxu1 %v8376_v63  ;;  %v236_v63 = vpack.c.bf16 %v9207_v32, %v9207_v32  ;;  %v8467_v32 = vld [vmem:[%s10939_s1 + $0x438] sm:$0xff] }
  0x32   :  { %4986 = vmatpush.bf16.msrb.mxu0 %v8367_v0  ;;  %v8434_v0 = vld [vmem:[%s10939_s1 + $0x330] sm:$0xff] }
  0x33   :  { %5012 = vmatpush.bf16.msrb.mxu2 %v8383_v1  ;;  %v8450_v1 = vld [vmem:[%s10939_s1 + $0x3b0] sm:$0xff] }
  0x34   :  { %5025 = vmatpush.bf16.msrb.mxu3 %v8391_v2  ;;  %v9305_v2 = vld.sshfl [vmem:[#allocation1 + $0x20] sm:$0xff pattern:$0x73625140] }
  0x35   :  { %4999 = vmatpush.bf16.msrb.mxu1 %v8375_v3  ;;  %v234_v3 = vpack.c.bf16 %v9199_v29, %v9199_v29  ;;  %v8437_v29 = vld [vmem:[%s10939_s1 + $0x348] sm:$0xff] }
  0x36   :  { %4987 = vmatpush.bf16.msrb.mxu0 %v8366_v4  ;;  %v9309_v4 = vld.sshfl [vmem:[#allocation1 + $0x30] sm:$0xff pattern:$0x73625140] }
  0x37   :  { %5013 = vmatpush.bf16.msrb.mxu2 %v8382_v5  ;;  %v9311_v5 = vld.sshfl [vmem:[#allocation1 + $0x28] sm:$0xff pattern:$0x73625140] }
  0x38   :  { %5026 = vmatpush.bf16.msrb.mxu3 %v8390_v6  ;;  %v8458_v6 = vld [vmem:[%s10939_s1 + $0x3f0] sm:$0xff] }
  0x39   :  { %5000 = vmatpush.bf16.msrb.mxu1 %v8374_v7  ;;  %v26_v7 = vld [vmem:[%s10940_s0 + $0x28] sm:$0xff] }
  0x3a   :  { %4988 = vmatpush.bf16.msrb.mxu0 %v8365_v8  ;;  %v9319_v8 = vld.sshfl [vmem:[#allocation1 + $0x38] sm:$0xff pattern:$0x73625140] }
  0x3b   :  { %5014 = vmatpush.bf16.msrb.mxu2 %v8381_v9  ;;  %v8442_v9 = vld [vmem:[%s10939_s1 + $0x370] sm:$0xff]  ;;  %81 = vst [vmem:[#allocation1 + $0x20] ss:$4 sm:$0xff] %v26_v7  ;;  %v8499_v7 = vld [vmem:[%s10939_s1 + $0x538] sm:$0xff] }
  0x3c   :  { %5027 = vmatpush.bf16.msrb.mxu3 %v8389_v10  ;;  %v8433_v10 = vld [vmem:[%s10939_s1 + $0x328] sm:$0xff] }
  0x3d   :  { %5001 = vmatpush.bf16.msrb.mxu1 %v8373_v11  ;;  %v8449_v11 = vld [vmem:[%s10939_s1 + $0x3a8] sm:$0xff] }
  0x3e   :  { %4989 = vmatpush.bf16.msrb.mxu0 %v8364_v12  ;;  %v8457_v12 = vld [vmem:[%s10939_s1 + $0x3e8] sm:$0xff] }
  0x3f   :  { %5015 = vmatpush.bf16.msrb.mxu2 %v8380_v13  ;;  %v8441_v13 = vld [vmem:[%s10939_s1 + $0x368] sm:$0xff] }
  0x40   :  { %5028 = vmatpush.bf16.msrb.mxu3 %v8388_v14  ;;  %v8432_v14 = vld [vmem:[%s10939_s1 + $0x320] sm:$0xff] }
  0x41   :  { %5002 = vmatpush.bf16.msrb.mxu1 %v8372_v18  ;;  %4990 = vmatmul.bf16.vlgmr.msrb.gmra.mxu0 %v229_v22  ;;  %v8431_v18 = vld [vmem:[%s10939_s1 + $0x318] sm:$0xff]  ;;  %v8430_v22 = vld [vmem:[%s10939_s1 + $0x310] sm:$0xff] }
  0x42   :  { %5034 = vmatpush.bf16.msra.mxu0 %v8403_v15  ;;  %5016 = vmatmul.bf16.vlgmr.msrb.gmra.mxu2 %v231_v20  ;;  %v8448_v15 = vld [vmem:[%s10939_s1 + $0x3a0] sm:$0xff]  ;;  %v8455_v20 = vld [vmem:[%s10939_s1 + $0x3d8] sm:$0xff] }
  0x43   :  { %5060 = vmatpush.bf16.msra.mxu2 %v8419_v16  ;;  %5029 = vmatmul.bf16.vlgmr.msrb.gmra.mxu3 %v232_v23  ;;  %v8456_v16 = vld [vmem:[%s10939_s1 + $0x3e0] sm:$0xff]  ;;  %v8446_v23 = vld [vmem:[%s10939_s1 + $0x390] sm:$0xff] }
  0x44   :  { %5073 = vmatpush.bf16.msra.mxu3 %v8427_v17  ;;  %5003 = vmatmul.bf16.vlgmr.msrb.gmra.mxu1 %v230_v27  ;;  %v8440_v17 = vld [vmem:[%s10939_s1 + $0x360] sm:$0xff]  ;;  %v8445_v27 = vld [vmem:[%s10939_s1 + $0x388] sm:$0xff] }
  0x45   :  { %5047 = vmatpush.bf16.msra.mxu1 %v8411_v19  ;;  %v8447_v19 = vld [vmem:[%s10939_s1 + $0x398] sm:$0xff] }
  0x46   :  { %5035 = vmatpush.bf16.msra.mxu0 %v8402_v21  ;;  %v8439_v21 = vld [vmem:[%s10939_s1 + $0x358] sm:$0xff] }
  0x47   :  { %5061 = vmatpush.bf16.msra.mxu2 %v8418_v24  ;;  %v8454_v24 = vld [vmem:[%s10939_s1 + $0x3d0] sm:$0xff] }
  0x48   :  { %5074 = vmatpush.bf16.msra.mxu3 %v8426_v25  ;;  %v8438_v25 = vld [vmem:[%s10939_s1 + $0x350] sm:$0xff] }
  0x49   :  { %5048 = vmatpush.bf16.msra.mxu1 %v8410_v30  ;;  %v8428_v30 = vld [vmem:[%s10939_s1 + $0x300] sm:$0xff] }
  0x4a   :  { %5036 = vmatpush.bf16.msra.mxu0 %v8401_v33  ;;  %v8452_v33 = vld [vmem:[%s10939_s1 + $0x3c0] sm:$0xff] }
  0x4b   :  { %5062 = vmatpush.bf16.msra.mxu2 %v8417_v34  ;;  %v8483_v34 = vld [vmem:[%s10939_s1 + $0x4b8] sm:$0xff] }
  0x4c   :  { %5075 = vmatpush.bf16.msra.mxu3 %v8425_v35  ;;  %v8491_v35 = vld [vmem:[%s10939_s1 + $0x4f8] sm:$0xff] }
  0x4d   :  { %5049 = vmatpush.bf16.msra.mxu1 %v8409_v36  ;;  %v8436_v36 = vld [vmem:[%s10939_s1 + $0x340] sm:$0xff] }
  0x4e   :  { %5037 = vmatpush.bf16.msra.mxu0 %v8400_v37  ;;  %v237_v37 = vpack.c.bf16 %v9305_v2, %v9305_v2  ;;  %v8460_v2 = vld [vmem:[%s10939_s1 + $0x400] sm:$0xff] }
  0x4f   :  { %5063 = vmatpush.bf16.msra.mxu2 %v8416_v38  ;;  %v239_v38 = vpack.c.bf16 %v9309_v4, %v9309_v4  ;;  %v8484_v4 = vld [vmem:[%s10939_s1 + $0x4c0] sm:$0xff] }
  0x50   :  { %5076 = vmatpush.bf16.msra.mxu3 %v8424_v39  ;;  %v8475_v39 = vld [vmem:[%s10939_s1 + $0x478] sm:$0xff] }
  0x51   :  { %5050 = vmatpush.bf16.msra.mxu1 %v8408_v40  ;;  %v240_v40 = vpack.c.bf16 %v9319_v8, %v9319_v8  ;;  %v8515_v8 = vld [vmem:[%s10939_s1 + $0x5b8] sm:$0xff] }
  0x52   :  { %5038 = vmatpush.bf16.msra.mxu0 %v8399_v41  ;;  %v238_v41 = vpack.c.bf16 %v9311_v5, %v9311_v5  ;;  %v82_v5 = vld.sshfl [vmem:[#allocation1] sm:$0xff pattern:$0x73625140] }
  0x53   :  { %5064 = vmatpush.bf16.msra.mxu2 %v8415_v42  ;;  %v8466_v42 = vld [vmem:[%s10939_s1 + $0x430] sm:$0xff] }
  0x54   :  { %5077 = vmatpush.bf16.msra.mxu3 %v8423_v43  ;;  %v8482_v43 = vld [vmem:[%s10939_s1 + $0x4b0] sm:$0xff] }
  0x55   :  { %5051 = vmatpush.bf16.msra.mxu1 %v8407_v44  ;;  %v8490_v44 = vld [vmem:[%s10939_s1 + $0x4f0] sm:$0xff] }
  0x56   :  { %5039 = vmatpush.bf16.msra.mxu0 %v8398_v45  ;;  %v8474_v45 = vld [vmem:[%s10939_s1 + $0x470] sm:$0xff] }
  0x57   :  { %5065 = vmatpush.bf16.msra.mxu2 %v8414_v46  ;;  %v8465_v46 = vld [vmem:[%s10939_s1 + $0x428] sm:$0xff] }
  0x58   :  { %5078 = vmatpush.bf16.msra.mxu3 %v8422_v47  ;;  %v8481_v47 = vld [vmem:[%s10939_s1 + $0x4a8] sm:$0xff] }
  0x59   :  { %5052 = vmatpush.bf16.msra.mxu1 %v8406_v48  ;;  %v8489_v48 = vld [vmem:[%s10939_s1 + $0x4e8] sm:$0xff] }
  0x5a   :  { %5040 = vmatpush.bf16.msra.mxu0 %v8397_v49  ;;  %v8473_v49 = vld [vmem:[%s10939_s1 + $0x468] sm:$0xff] }
  0x5b   :  { %5066 = vmatpush.bf16.msra.mxu2 %v8413_v50  ;;  %v8464_v50 = vld [vmem:[%s10939_s1 + $0x420] sm:$0xff] }
  0x5c   :  { %5079 = vmatpush.bf16.msra.mxu3 %v8421_v51  ;;  %v8480_v51 = vld [vmem:[%s10939_s1 + $0x4a0] sm:$0xff] }
  0x5d   :  { %5053 = vmatpush.bf16.msra.mxu1 %v8405_v52  ;;  %v8488_v52 = vld [vmem:[%s10939_s1 + $0x4e0] sm:$0xff] }
  0x5e   :  { %5041 = vmatpush.bf16.msra.mxu0 %v8396_v53  ;;  %v8472_v53 = vld [vmem:[%s10939_s1 + $0x460] sm:$0xff] }
  0x5f   :  { %5067 = vmatpush.bf16.msra.mxu2 %v8412_v54  ;;  %v8463_v54 = vld [vmem:[%s10939_s1 + $0x418] sm:$0xff] }
  0x60   :  { %5080 = vmatpush.bf16.msra.mxu3 %v8420_v55  ;;  %v8479_v55 = vld [vmem:[%s10939_s1 + $0x498] sm:$0xff] }
  0x61   :  { %5054 = vmatpush.bf16.msra.mxu1 %v8404_v59  ;;  %5042 = vmatmul.bf16.vlgmr.msra.gmra.mxu0 %v233_v60  ;;  %v8478_v59 = vld [vmem:[%s10939_s1 + $0x490] sm:$0xff] }
  0x62   :  { %5086 = vmatpush.bf16.msrb.mxu0 %v8435_v56  ;;  %5068 = vmatmul.bf16.vlgmr.msra.gmra.mxu2 %v235_v61  ;;  %v8487_v56 = vld [vmem:[%s10939_s1 + $0x4d8] sm:$0xff]  ;;  %v8486_v60 = vld [vmem:[%s10939_s1 + $0x4d0] sm:$0xff] }
  0x63   :  { %5112 = vmatpush.bf16.msrb.mxu2 %v8451_v57  ;;  %5081 = vmatmul.bf16.vlgmr.msra.gmra.mxu3 %v236_v63  ;;  %v8471_v57 = vld [vmem:[%s10939_s1 + $0x458] sm:$0xff]  ;;  %v8470_v61 = vld [vmem:[%s10939_s1 + $0x450] sm:$0xff]  ;;  %v8477_v63 = vld [vmem:[%s10939_s1 + $0x488] sm:$0xff] }
  0x64   :  { %5125 = vmatpush.bf16.msrb.mxu3 %v8459_v58  ;;  %5055 = vmatmul.bf16.vlgmr.msra.gmra.mxu1 %v234_v3  ;;  %v8462_v58 = vld [vmem:[%s10939_s1 + $0x410] sm:$0xff]  ;;  %v8476_v3 = vld [vmem:[%s10939_s1 + $0x480] sm:$0xff] }
  0x65   :  { %5099 = vmatpush.bf16.msrb.mxu1 %v8443_v62  ;;  %v8461_v62 = vld [vmem:[%s10939_s1 + $0x408] sm:$0xff] }
  0x66   :  { %5087 = vmatpush.bf16.msrb.mxu0 %v8434_v0  ;;  %v8485_v0 = vld [vmem:[%s10939_s1 + $0x4c8] sm:$0xff] }
  0x67   :  { %5113 = vmatpush.bf16.msrb.mxu2 %v8450_v1  ;;  %v8469_v1 = vld [vmem:[%s10939_s1 + $0x448] sm:$0xff] }
  0x68   :  { %5126 = vmatpush.bf16.msrb.mxu3 %v8458_v6  ;;  %v84_v6 = vld.sshfl [vmem:[#allocation1 + $0x10] sm:$0xff pattern:$0x73625140] }
  0x69   :  { %5100 = vmatpush.bf16.msrb.mxu1 %v8442_v9  ;;  %v85_v9 = vld.sshfl [vmem:[#allocation1 + $0x18] sm:$0xff pattern:$0x73625140] }
  0x6a   :  { %5088 = vmatpush.bf16.msrb.mxu0 %v8433_v10  ;;  %v8523_v10 = vld [vmem:[%s10939_s1 + $0x5f8] sm:$0xff] }
  0x6b   :  { %5114 = vmatpush.bf16.msrb.mxu2 %v8449_v11  ;;  %v8468_v11 = vld [vmem:[%s10939_s1 + $0x440] sm:$0xff] }
  0x6c   :  { %5127 = vmatpush.bf16.msrb.mxu3 %v8457_v12  ;;  %v83_v12 = vld.sshfl [vmem:[#allocation1 + $0x8] sm:$0xff pattern:$0x73625140] }
  0x6d   :  { %5101 = vmatpush.bf16.msrb.mxu1 %v8441_v13  ;;  %v241_v13 = vpack.c.bf16 %v82_v5, %v82_v5  ;;  %v8539_v5 = vld [vmem:[%s10939_s1 + $0x678] sm:$0xff] }
  0x6e   :  { %5089 = vmatpush.bf16.msrb.mxu0 %v8432_v14  ;;  %v243_v14 = vpack.c.bf16 %v84_v6, %v84_v6 }
  0x6f   :  { %5115 = vmatpush.bf16.msrb.mxu2 %v8448_v15  ;;  %v8507_v15 = vld [vmem:[%s10939_s1 + $0x578] sm:$0xff] }
  0x70   :  { %5128 = vmatpush.bf16.msrb.mxu3 %v8456_v16  ;;  %v244_v16 = vpack.c.bf16 %v85_v9, %v85_v9  ;;  %v8546_v9 = vld [vmem:[%s10939_s1 + $0x6b0] sm:$0xff] }
  0x71   :  { %5102 = vmatpush.bf16.msrb.mxu1 %v8440_v17  ;;  %v242_v17 = vpack.c.bf16 %v83_v12, %v83_v12  ;;  %v8529_v12 = vld [vmem:[%s10939_s1 + $0x628] sm:$0xff] }
  0x72   :  { %5090 = vmatpush.bf16.msrb.mxu0 %v8431_v18  ;;  %v8498_v18 = vld [vmem:[%s10939_s1 + $0x530] sm:$0xff] }
  0x73   :  { %5116 = vmatpush.bf16.msrb.mxu2 %v8447_v19  ;;  %v8514_v19 = vld [vmem:[%s10939_s1 + $0x5b0] sm:$0xff] }
  0x74   :  { %5129 = vmatpush.bf16.msrb.mxu3 %v8455_v20  ;;  %v8522_v20 = vld [vmem:[%s10939_s1 + $0x5f0] sm:$0xff] }
  0x75   :  { %5103 = vmatpush.bf16.msrb.mxu1 %v8439_v21  ;;  %v8506_v21 = vld [vmem:[%s10939_s1 + $0x570] sm:$0xff] }
  0x76   :  { %5091 = vmatpush.bf16.msrb.mxu0 %v8430_v22  ;;  %v8497_v22 = vld [vmem:[%s10939_s1 + $0x528] sm:$0xff] }
  0x77   :  { %5117 = vmatpush.bf16.msrb.mxu2 %v8446_v23  ;;  %v8513_v23 = vld [vmem:[%s10939_s1 + $0x5a8] sm:$0xff] }
  0x78   :  { %5130 = vmatpush.bf16.msrb.mxu3 %v8454_v24  ;;  %v8521_v24 = vld [vmem:[%s10939_s1 + $0x5e8] sm:$0xff] }
  0x79   :  { %5104 = vmatpush.bf16.msrb.mxu1 %v8438_v25  ;;  %v8918_v25 = vld [vmem:[%s10941_s2] ss:$0 sm:$0xff] }
  0x7a   :  { %5092 = vmatpush.bf16.msrb.mxu0 %v8429_v26  ;;  %v8505_v26 = vld [vmem:[%s10939_s1 + $0x568] sm:$0xff] }
  0x7b   :  { %5118 = vmatpush.bf16.msrb.mxu2 %v8445_v27  ;;  %v8496_v27 = vld [vmem:[%s10939_s1 + $0x520] sm:$0xff] }
  0x7c   :  { %5131 = vmatpush.bf16.msrb.mxu3 %v8453_v28  ;;  %v8512_v28 = vld [vmem:[%s10939_s1 + $0x5a0] sm:$0xff] }
  0x7d   :  { %5105 = vmatpush.bf16.msrb.mxu1 %v8437_v29  ;;  %v8520_v29 = vld [vmem:[%s10939_s1 + $0x5e0] sm:$0xff] }
  0x7e   :  { %5093 = vmatpush.bf16.msrb.mxu0 %v8428_v30 }
  0x7f   :  { %5119 = vmatpush.bf16.msrb.mxu2 %v8444_v31 }
  0x80   :  { %5132 = vmatpush.bf16.msrb.mxu3 %v8452_v33  ;;  %v8495_v33 = vld [vmem:[%s10939_s1 + $0x518] sm:$0xff] }
  0x81   :  { %5106 = vmatpush.bf16.msrb.mxu1 %v8436_v36  ;;  %5094 = vmatmul.bf16.vlgmr.msrb.gmra.mxu0 %v237_v37  ;;  %v8519_v36 = vld [vmem:[%s10939_s1 + $0x5d8] sm:$0xff] }
  0x82   :  { %5138 = vmatpush.bf16.msra.mxu0 %v8467_v32  ;;  %5120 = vmatmul.bf16.vlgmr.msrb.gmra.mxu2 %v239_v38  ;;  %v8504_v32 = vld [vmem:[%s10939_s1 + $0x560] sm:$0xff] }
  0x83   :  { %5164 = vmatpush.bf16.msra.mxu2 %v8483_v34  ;;  %5133 = vmatmul.bf16.vlgmr.msrb.gmra.mxu3 %v240_v40 }
  0x84   :  { %5177 = vmatpush.bf16.msra.mxu3 %v8491_v35  ;;  %5107 = vmatmul.bf16.vlgmr.msrb.gmra.mxu1 %v238_v41  ;;  %v8511_v35 = vld [vmem:[%s10939_s1 + $0x598] sm:$0xff]  ;;  %v8494_v41 = vld [vmem:[%s10939_s1 + $0x510] sm:$0xff] }
  0x85   :  { %5151 = vmatpush.bf16.msra.mxu1 %v8475_v39  ;;  %v8503_v39 = vld [vmem:[%s10939_s1 + $0x558] sm:$0xff] }
  0x86   :  { %5139 = vmatpush.bf16.msra.mxu0 %v8466_v42 }
  0x87   :  { %5165 = vmatpush.bf16.msra.mxu2 %v8482_v43  ;;  %v8510_v43 = vld [vmem:[%s10939_s1 + $0x590] sm:$0xff] }
  0x88   :  { %5178 = vmatpush.bf16.msra.mxu3 %v8490_v44  ;;  %v8518_v44 = vld [vmem:[%s10939_s1 + $0x5d0] sm:$0xff] }
  0x89   :  { %5152 = vmatpush.bf16.msra.mxu1 %v8474_v45 }
  0x8a   :  { %5140 = vmatpush.bf16.msra.mxu0 %v8465_v46 }
  0x8b   :  { %5166 = vmatpush.bf16.msra.mxu2 %v8481_v47  ;;  %v8502_v47 = vld [vmem:[%s10939_s1 + $0x550] sm:$0xff] }
  0x8c   :  { %5179 = vmatpush.bf16.msra.mxu3 %v8489_v48  ;;  %v8493_v48 = vld [vmem:[%s10939_s1 + $0x508] sm:$0xff] }
  0x8d   :  { %5153 = vmatpush.bf16.msra.mxu1 %v8473_v49 }
  0x8e   :  { %5141 = vmatpush.bf16.msra.mxu0 %v8464_v50  ;;  %v27_v50 = vld [vmem:[%s10940_s0 + $0x30] sm:$0xff] }
  0x8f   :  { %5167 = vmatpush.bf16.msra.mxu2 %v8480_v51  ;;  %v8509_v51 = vld [vmem:[%s10939_s1 + $0x588] sm:$0xff]  ;;  %90 = vst [vmem:[#allocation1] ss:$4 sm:$0xff] %v27_v50  ;;  %v8563_v50 = vld [vmem:[%s10939_s1 + $0x738] sm:$0xff] }
  0x90   :  { %5180 = vmatpush.bf16.msra.mxu3 %v8488_v52  ;;  %v8517_v52 = vld [vmem:[%s10939_s1 + $0x5c8] sm:$0xff] }
  0x91   :  { %5154 = vmatpush.bf16.msra.mxu1 %v8472_v53 }
  0x92   :  { %5142 = vmatpush.bf16.msra.mxu0 %v8463_v54  ;;  %v8501_v54 = vld [vmem:[%s10939_s1 + $0x548] sm:$0xff] }
  0x93   :  { %5168 = vmatpush.bf16.msra.mxu2 %v8479_v55  ;;  %v8492_v55 = vld [vmem:[%s10939_s1 + $0x500] sm:$0xff] }
  0x94   :  { %5181 = vmatpush.bf16.msra.mxu3 %v8487_v56  ;;  %v8508_v56 = vld [vmem:[%s10939_s1 + $0x580] sm:$0xff] }
  0x95   :  { %5155 = vmatpush.bf16.msra.mxu1 %v8471_v57  ;;  %v8516_v57 = vld [vmem:[%s10939_s1 + $0x5c0] sm:$0xff] }
  0x96   :  { %5143 = vmatpush.bf16.msra.mxu0 %v8462_v58 }
  0x97   :  { %5169 = vmatpush.bf16.msra.mxu2 %v8478_v59  ;;  %v86_v59 = vld.sshfl [vmem:[#allocation1 + $0x20] sm:$0xff pattern:$0x73625140] }
  0x98   :  { %5182 = vmatpush.bf16.msra.mxu3 %v8486_v60  ;;  %v88_v60 = vld.sshfl [vmem:[#allocation1 + $0x30] sm:$0xff pattern:$0x73625140] }
  0x99   :  { %5156 = vmatpush.bf16.msra.mxu1 %v8470_v61  ;;  %v8531_v61 = vld [vmem:[%s10939_s1 + $0x638] sm:$0xff] }
  0x9a   :  { %5144 = vmatpush.bf16.msra.mxu0 %v8461_v62  ;;  %v8547_v62 = vld [vmem:[%s10939_s1 + $0x6b8] sm:$0xff] }
  0x9b   :  { %5170 = vmatpush.bf16.msra.mxu2 %v8477_v63  ;;  %v89_v63 = vld.sshfl [vmem:[#allocation1 + $0x38] sm:$0xff pattern:$0x73625140] }
  0x9c   :  { %5183 = vmatpush.bf16.msra.mxu3 %v8485_v0  ;;  %v8555_v0 = vld [vmem:[%s10939_s1 + $0x6f8] sm:$0xff]  ;;  %v248_v6 = vpack.c.bf16 %v89_v63, %v89_v63  ;;  %v8586_v63 = vld [vmem:[%s10939_s1 + $0x7f0] sm:$0xff] }
  0x9d   :  { %5157 = vmatpush.bf16.msra.mxu1 %v8469_v1  ;;  %v8500_v1 = vld [vmem:[%s10939_s1 + $0x540] sm:$0xff] }
  0x9e   :  { %5145 = vmatpush.bf16.msra.mxu0 %v8460_v2  ;;  %v4939_v30 = vpop.f32.mrf.mxu0  ;;  %v87_v2 = vld.sshfl [vmem:[#allocation1 + $0x28] sm:$0xff pattern:$0x73625140] }
  0x9f   :  { %5171 = vmatpush.bf16.msra.mxu2 %v8476_v3  ;;  %v4940_v31 = vadd.f32 %v8918_v25, %v4939_v30  ;;  %v245_v3 = vpack.c.bf16 %v86_v59, %v86_v59  ;;  %v8543_v25 = vld [vmem:[%s10939_s1 + $0x698] sm:$0xff] }
  0xa0   :  { %5184 = vmatpush.bf16.msra.mxu3 %v8484_v4  ;;  %v247_v4 = vpack.c.bf16 %v88_v60, %v88_v60 }
  0xa1   :  { %5158 = vmatpush.bf16.msra.mxu1 %v8468_v11  ;;  %5146 = vmatmul.bf16.vlgmr.msra.gmra.mxu0 %v241_v13  ;;  %v4952_v34 = vpop.f32.mrf.mxu1  ;;  %v8538_v11 = vld [vmem:[%s10939_s1 + $0x670] sm:$0xff]  ;;  %v8545_v13 = vld [vmem:[%s10939_s1 + $0x6a8] sm:$0xff] }
  0xa2   :  { %5190 = vmatpush.bf16.msrb.mxu0 %v8499_v7  ;;  %5172 = vmatmul.bf16.vlgmr.msra.gmra.mxu2 %v243_v14  ;;  %v4953_v37 = vadd.f32 %v4952_v34, %v4940_v31  ;;  %v246_v7 = vpack.c.bf16 %v87_v2, %v87_v2  ;;  %v8553_v14 = vld [vmem:[%s10939_s1 + $0x6e8] sm:$0xff]  ;;  %v8526_v31 = vld [vmem:[%s10939_s1 + $0x610] sm:$0xff] }
  0xa3   :  { %5216 = vmatpush.bf16.msrb.mxu2 %v8515_v8  ;;  %5185 = vmatmul.bf16.vlgmr.msra.gmra.mxu3 %v244_v16  ;;  %v8530_v8 = vld [vmem:[%s10939_s1 + $0x630] sm:$0xff]  ;;  %v8528_v16 = vld [vmem:[%s10939_s1 + $0x620] sm:$0xff]  ;;  %v8577_v2 = vld [vmem:[%s10939_s1 + $0x7a8] sm:$0xff] }
  0xa4   :  { %5229 = vmatpush.bf16.msrb.mxu3 %v8523_v10  ;;  %5159 = vmatmul.bf16.vlgmr.msra.gmra.mxu1 %v242_v17  ;;  %v8554_v10 = vld [vmem:[%s10939_s1 + $0x6f0] sm:$0xff]  ;;  %v8544_v17 = vld [vmem:[%s10939_s1 + $0x6a0] sm:$0xff] }
  0xa5   :  { %5203 = vmatpush.bf16.msrb.mxu1 %v8507_v15  ;;  %v4965_v38 = vpop.f32.mrf.mxu2  ;;  %v8537_v15 = vld [vmem:[%s10939_s1 + $0x668] sm:$0xff] }
  0xa6   :  { %5191 = vmatpush.bf16.msrb.mxu0 %v8498_v18  ;;  %v4966_v40 = vadd.f32 %v4965_v38, %v4953_v37  ;;  %v4978_v42 = vpop.f32.mrf.mxu3  ;;  %v4941_v46 = vpop.f32.mrf.mxu0  ;;  %v8552_v18 = vld [vmem:[%s10939_s1 + $0x6e0] sm:$0xff]  ;;  %v8525_v38 = vld [vmem:[%s10939_s1 + $0x608] sm:$0xff] }
  0xa7   :  { %5217 = vmatpush.bf16.msrb.mxu2 %v8514_v19  ;;  %v8540_v46 = vld [vmem:[%s10939_s1 + $0x680] sm:$0xff] }
  0xa8   :  { %5230 = vmatpush.bf16.msrb.mxu3 %v8522_v20  ;;  %v9572_v45 = vadd.f32 %v4978_v42, %v4966_v40  ;;  %v8541_v40 = vld [vmem:[%s10939_s1 + $0x688] sm:$0xff] }
  0xa9   :  { %5204 = vmatpush.bf16.msrb.mxu1 %v8506_v21  ;;  %v4954_v49 = vpop.f32.mrf.mxu1  ;;  %v8536_v21 = vld [vmem:[%s10939_s1 + $0x660] sm:$0xff] }
  0xaa   :  { %5192 = vmatpush.bf16.msrb.mxu0 %v8497_v22  ;;  %v94_v49 = vld.sshfl [vmem:[#allocation1 + $0x10] sm:$0xff pattern:$0x73625140] }
  0xab   :  { %5218 = vmatpush.bf16.msrb.mxu2 %v8513_v23  ;;  %v8527_v23 = vld [vmem:[%s10939_s1 + $0x618] sm:$0xff] }
  0xac   :  { %5231 = vmatpush.bf16.msrb.mxu3 %v8521_v24 }
  0xad   :  { %5205 = vmatpush.bf16.msrb.mxu1 %v8505_v26  ;;  %v4967_v53 = vpop.f32.mrf.mxu2  ;;  %v8551_v26 = vld [vmem:[%s10939_s1 + $0x6d8] sm:$0xff] }
  0xae   :  { %5193 = vmatpush.bf16.msrb.mxu0 %v8496_v27  ;;  %v4980_v58 = vpop.f32.mrf.mxu3  ;;  %v8587_v53 = vld [vmem:[%s10939_s1 + $0x7f8] sm:$0xff] }
  0xaf   :  { %5219 = vmatpush.bf16.msrb.mxu2 %v8512_v28  ;;  %v8535_v28 = vld [vmem:[%s10939_s1 + $0x658] sm:$0xff] }
  0xb0   :  { %5232 = vmatpush.bf16.msrb.mxu3 %v8520_v29  ;;  %v8571_v58 = vld [vmem:[%s10939_s1 + $0x778] sm:$0xff] }
  0xb1   :  { %5206 = vmatpush.bf16.msrb.mxu1 %v8504_v32  ;;  %v8542_v32 = vld [vmem:[%s10939_s1 + $0x690] sm:$0xff] }
  0xb2   :  { %5194 = vmatpush.bf16.msrb.mxu0 %v8495_v33  ;;  %v8550_v33 = vld [vmem:[%s10939_s1 + $0x6d0] sm:$0xff] }
  0xb3   :  { %5220 = vmatpush.bf16.msrb.mxu2 %v8511_v35 }
  0xb4   :  { %5233 = vmatpush.bf16.msrb.mxu3 %v8519_v36  ;;  %v8534_v36 = vld [vmem:[%s10939_s1 + $0x650] sm:$0xff] }
  0xb5   :  { %5207 = vmatpush.bf16.msrb.mxu1 %v8503_v39  ;;  %v28_v39 = vld [vmem:[%s10940_s0 + $0x38] sm:$0xff] }
  0xb6   :  { %5195 = vmatpush.bf16.msrb.mxu0 %v8494_v41  ;;  %v8549_v41 = vld [vmem:[%s10939_s1 + $0x6c8] sm:$0xff]  ;;  %91 = vst [vmem:[#allocation1 + $0x20] ss:$4 sm:$0xff] %v28_v39  ;;  %v8595_v39 = vld [vmem:[%s10939_s1 + $0x838] sm:$0xff] }
  0xb7   :  { %5221 = vmatpush.bf16.msrb.mxu2 %v8510_v43  ;;  %v8533_v43 = vld [vmem:[%s10939_s1 + $0x648] sm:$0xff] }
  0xb8   :  { %5234 = vmatpush.bf16.msrb.mxu3 %v8518_v44 }
  0xb9   :  { %5208 = vmatpush.bf16.msrb.mxu1 %v8502_v47  ;;  %v8548_v47 = vld [vmem:[%s10939_s1 + $0x6c0] sm:$0xff] }
  0xba   :  { %5196 = vmatpush.bf16.msrb.mxu0 %v8493_v48  ;;  %v92_v48 = vld.sshfl [vmem:[#allocation1] sm:$0xff pattern:$0x73625140] }
  0xbb   :  { %5222 = vmatpush.bf16.msrb.mxu2 %v8509_v51  ;;  %v8579_v51 = vld [vmem:[%s10939_s1 + $0x7b8] sm:$0xff] }
  0xbc   :  { %5235 = vmatpush.bf16.msrb.mxu3 %v8517_v52  ;;  %v95_v52 = vld.sshfl [vmem:[#allocation1 + $0x18] sm:$0xff pattern:$0x73625140] }
  0xbd   :  { %5209 = vmatpush.bf16.msrb.mxu1 %v8501_v54  ;;  %v8532_v54 = vld [vmem:[%s10939_s1 + $0x640] sm:$0xff]  ;;  %v252_v59 = vpack.c.bf16 %v95_v52, %v95_v52  ;;  %v8618_v52 = vld [vmem:[%s10939_s1 + $0x8f0] sm:$0xff] }
  0xbe   :  { %5197 = vmatpush.bf16.msrb.mxu0 %v8492_v55  ;;  %v4991_v19 = vpop.f32.mrf.mxu0  ;;  %v93_v55 = vld.sshfl [vmem:[#allocation1 + $0x8] sm:$0xff pattern:$0x73625140] }
  0xbf   :  { %5223 = vmatpush.bf16.msrb.mxu2 %v8508_v56  ;;  %v4992_v20 = vadd.f32 %v4991_v19, %v9572_v45  ;;  %v8524_v45 = vld [vmem:[%s10939_s1 + $0x600] sm:$0xff]  ;;  %v249_v56 = vpack.c.bf16 %v92_v48, %v92_v48  ;;  %v250_v60 = vpack.c.bf16 %v93_v55, %v93_v55  ;;  %v8609_v55 = vld [vmem:[%s10939_s1 + $0x8a8] sm:$0xff] }
  0xc0   :  { %5236 = vmatpush.bf16.msrb.mxu3 %v8516_v57  ;;  %v251_v57 = vpack.c.bf16 %v94_v49, %v94_v49 }
  0xc1   :  { %5210 = vmatpush.bf16.msrb.mxu1 %v8500_v1  ;;  %5198 = vmatmul.bf16.vlgmr.msrb.gmra.mxu0 %v245_v3  ;;  %v5004_v22 = vpop.f32.mrf.mxu1  ;;  %v8561_v1 = vld [vmem:[%s10939_s1 + $0x728] sm:$0xff] }
  0xc2   :  { %5242 = vmatpush.bf16.msra.mxu0 %v8531_v61  ;;  %5224 = vmatmul.bf16.vlgmr.msrb.gmra.mxu2 %v247_v4  ;;  %v5005_v24 = vadd.f32 %v5004_v22, %v4992_v20  ;;  %v8562_v61 = vld [vmem:[%s10939_s1 + $0x730] sm:$0xff]  ;;  %v8585_v3 = vld [vmem:[%s10939_s1 + $0x7e8] sm:$0xff] }
  0xc3   :  { %5268 = vmatpush.bf16.msra.mxu2 %v8547_v62  ;;  %5237 = vmatmul.bf16.vlgmr.msrb.gmra.mxu3 %v248_v6  ;;  %v8578_v62 = vld [vmem:[%s10939_s1 + $0x7b0] sm:$0xff]  ;;  %v8569_v4 = vld [vmem:[%s10939_s1 + $0x768] sm:$0xff] }
  0xc4   :  { %5281 = vmatpush.bf16.msra.mxu3 %v8555_v0  ;;  %5211 = vmatmul.bf16.vlgmr.msrb.gmra.mxu1 %v246_v7  ;;  %v8570_v0 = vld [vmem:[%s10939_s1 + $0x770] sm:$0xff]  ;;  %v8560_v7 = vld [vmem:[%s10939_s1 + $0x720] sm:$0xff] }
  0xc5   :  { %5255 = vmatpush.bf16.msra.mxu1 %v8539_v5  ;;  %v5017_v27 = vpop.f32.mrf.mxu2 }
  0xc6   :  { %5243 = vmatpush.bf16.msra.mxu0 %v8530_v8  ;;  %v5018_v29 = vadd.f32 %v5017_v27, %v5005_v24  ;;  %v5030_v30 = vpop.f32.mrf.mxu3  ;;  %v4993_v35 = vpop.f32.mrf.mxu0  ;;  %v8576_v8 = vld [vmem:[%s10939_s1 + $0x7a0] sm:$0xff]  ;;  %v8582_v24 = vld [vmem:[%s10939_s1 + $0x7d0] sm:$0xff]  ;;  %v8557_v27 = vld [vmem:[%s10939_s1 + $0x708] sm:$0xff] }
  0xc7   :  { %5269 = vmatpush.bf16.msra.mxu2 %v8546_v9  ;;  %v8584_v9 = vld [vmem:[%s10939_s1 + $0x7e0] sm:$0xff] }
  0xc8   :  { %5282 = vmatpush.bf16.msra.mxu3 %v8554_v10  ;;  %v9674_v34 = vadd.f32 %v5030_v30, %v5018_v29  ;;  %v8573_v29 = vld [vmem:[%s10939_s1 + $0x788] sm:$0xff]  ;;  %v8572_v35 = vld [vmem:[%s10939_s1 + $0x780] sm:$0xff] }
  0xc9   :  { %5256 = vmatpush.bf16.msra.mxu1 %v8538_v11  ;;  %v5006_v37 = vpop.f32.mrf.mxu1  ;;  %v8581_v30 = vld [vmem:[%s10939_s1 + $0x7c8] sm:$0xff] }
  0xca   :  { %5244 = vmatpush.bf16.msra.mxu0 %v8529_v12  ;;  %v8568_v12 = vld [vmem:[%s10939_s1 + $0x760] sm:$0xff] }
  0xcb   :  { %5270 = vmatpush.bf16.msra.mxu2 %v8545_v13  ;;  %v8559_v13 = vld [vmem:[%s10939_s1 + $0x718] sm:$0xff]  ;;  %v96_v37 = vld.sshfl [vmem:[#allocation1 + $0x20] sm:$0xff pattern:$0x73625140] }
  0xcc   :  { %5283 = vmatpush.bf16.msra.mxu3 %v8553_v14  ;;  %v8575_v14 = vld [vmem:[%s10939_s1 + $0x798] sm:$0xff] }
  0xcd   :  { %5257 = vmatpush.bf16.msra.mxu1 %v8537_v15  ;;  %v5019_v42 = vpop.f32.mrf.mxu2  ;;  %v8583_v15 = vld [vmem:[%s10939_s1 + $0x7d8] sm:$0xff] }
  0xce   :  { %5245 = vmatpush.bf16.msra.mxu0 %v8528_v16  ;;  %v5032_v44 = vpop.f32.mrf.mxu3  ;;  %v8619_v42 = vld [vmem:[%s10939_s1 + $0x8f8] sm:$0xff] }
  0xcf   :  { %5271 = vmatpush.bf16.msra.mxu2 %v8544_v17  ;;  %v97_v44 = vld.sshfl [vmem:[#allocation1 + $0x28] sm:$0xff pattern:$0x73625140] }
  0xd0   :  { %5284 = vmatpush.bf16.msra.mxu3 %v8552_v18  ;;  %v8567_v18 = vld [vmem:[%s10939_s1 + $0x758] sm:$0xff]  ;;  %v254_v49 = vpack.c.bf16 %v97_v44, %v97_v44  ;;  %v8641_v44 = vld [vmem:[%s10939_s1 + $0x9a8] sm:$0xff] }
  0xd1   :  { %5258 = vmatpush.bf16.msra.mxu1 %v8536_v21  ;;  %v8558_v21 = vld [vmem:[%s10939_s1 + $0x710] sm:$0xff] }
  0xd2   :  { %5246 = vmatpush.bf16.msra.mxu0 %v8527_v23  ;;  %v8574_v23 = vld [vmem:[%s10939_s1 + $0x790] sm:$0xff] }
  0xd3   :  { %5272 = vmatpush.bf16.msra.mxu2 %v8543_v25 }
  0xd4   :  { %5285 = vmatpush.bf16.msra.mxu3 %v8551_v26  ;;  %v8566_v26 = vld [vmem:[%s10939_s1 + $0x750] sm:$0xff] }
  0xd5   :  { %5259 = vmatpush.bf16.msra.mxu1 %v8535_v28  ;;  %v29_v28 = vld [vmem:[%s10940_s0 + $0x40] sm:$0xff] }
  0xd6   :  { %5247 = vmatpush.bf16.msra.mxu0 %v8526_v31  ;;  %100 = vst [vmem:[#allocation1] ss:$4 sm:$0xff] %v29_v28  ;;  %v8627_v28 = vld [vmem:[%s10939_s1 + $0x938] sm:$0xff] }
  0xd7   :  { %5273 = vmatpush.bf16.msra.mxu2 %v8542_v32  ;;  %v8565_v32 = vld [vmem:[%s10939_s1 + $0x748] sm:$0xff] }
  0xd8   :  { %5286 = vmatpush.bf16.msra.mxu3 %v8550_v33 }
  0xd9   :  { %5260 = vmatpush.bf16.msra.mxu1 %v8534_v36  ;;  %v8580_v36 = vld [vmem:[%s10939_s1 + $0x7c0] sm:$0xff] }
  0xda   :  { %5248 = vmatpush.bf16.msra.mxu0 %v8525_v38  ;;  %v98_v38 = vld.sshfl [vmem:[#allocation1 + $0x30] sm:$0xff pattern:$0x73625140] }
  0xdb   :  { %5274 = vmatpush.bf16.msra.mxu2 %v8541_v40  ;;  %v8611_v40 = vld [vmem:[%s10939_s1 + $0x8b8] sm:$0xff] }
  0xdc   :  { %5287 = vmatpush.bf16.msra.mxu3 %v8549_v41  ;;  %v99_v41 = vld.sshfl [vmem:[#allocation1 + $0x38] sm:$0xff pattern:$0x73625140] }
  0xdd   :  { %5261 = vmatpush.bf16.msra.mxu1 %v8533_v43  ;;  %v8564_v43 = vld [vmem:[%s10939_s1 + $0x740] sm:$0xff]  ;;  %v256_v48 = vpack.c.bf16 %v99_v41, %v99_v41  ;;  %v8650_v41 = vld [vmem:[%s10939_s1 + $0x9f0] sm:$0xff] }
  0xde   :  { %5249 = vmatpush.bf16.msra.mxu0 %v8524_v45  ;;  %v5043_v5 = vpop.f32.mrf.mxu0  ;;  %v253_v45 = vpack.c.bf16 %v96_v37, %v96_v37 }
  0xdf   :  { %5275 = vmatpush.bf16.msra.mxu2 %v8540_v46  ;;  %v5044_v6 = vadd.f32 %v5043_v5, %v9674_v34  ;;  %v8556_v34 = vld [vmem:[%s10939_s1 + $0x700] sm:$0xff]  ;;  %v255_v46 = vpack.c.bf16 %v98_v38, %v98_v38 }
  0xe0   :  { %5288 = vmatpush.bf16.msra.mxu3 %v8548_v47  ;;  %v8603_v47 = vld [vmem:[%s10939_s1 + $0x878] sm:$0xff] }
  0xe1   :  { %5262 = vmatpush.bf16.msra.mxu1 %v8532_v54  ;;  %5250 = vmatmul.bf16.vlgmr.msra.gmra.mxu0 %v249_v56  ;;  %v5056_v10 = vpop.f32.mrf.mxu1  ;;  %v8593_v54 = vld [vmem:[%s10939_s1 + $0x828] sm:$0xff] }
  0xe2   :  { %5294 = vmatpush.bf16.msrb.mxu0 %v8563_v50  ;;  %5276 = vmatmul.bf16.vlgmr.msra.gmra.mxu2 %v251_v57  ;;  %v5057_v11 = vadd.f32 %v5056_v10, %v5044_v6  ;;  %v8594_v50 = vld [vmem:[%s10939_s1 + $0x830] sm:$0xff]  ;;  %v8617_v56 = vld [vmem:[%s10939_s1 + $0x8e8] sm:$0xff] }
  0xe3   :  { %5320 = vmatpush.bf16.msrb.mxu2 %v8579_v51  ;;  %5289 = vmatmul.bf16.vlgmr.msra.gmra.mxu3 %v252_v59  ;;  %v8610_v51 = vld [vmem:[%s10939_s1 + $0x8b0] sm:$0xff]  ;;  %v8601_v57 = vld [vmem:[%s10939_s1 + $0x868] sm:$0xff] }
  0xe4   :  { %5333 = vmatpush.bf16.msrb.mxu3 %v8587_v53  ;;  %5263 = vmatmul.bf16.vlgmr.msra.gmra.mxu1 %v250_v60  ;;  %v8602_v53 = vld [vmem:[%s10939_s1 + $0x870] sm:$0xff]  ;;  %v8592_v60 = vld [vmem:[%s10939_s1 + $0x820] sm:$0xff] }
  0xe5   :  { %5307 = vmatpush.bf16.msrb.mxu1 %v8571_v58  ;;  %v5069_v16 = vpop.f32.mrf.mxu2 }
  0xe6   :  { %5295 = vmatpush.bf16.msrb.mxu0 %v8562_v61  ;;  %v5070_v17 = vadd.f32 %v5069_v16, %v5057_v11  ;;  %v5082_v19 = vpop.f32.mrf.mxu3  ;;  %v5045_v20 = vpop.f32.mrf.mxu0  ;;  %v8608_v61 = vld [vmem:[%s10939_s1 + $0x8a0] sm:$0xff]  ;;  %v8590_v11 = vld [vmem:[%s10939_s1 + $0x810] sm:$0xff]  ;;  %v8589_v16 = vld [vmem:[%s10939_s1 + $0x808] sm:$0xff] }
  0xe7   :  { %5321 = vmatpush.bf16.msrb.mxu2 %v8578_v62  ;;  %v8616_v62 = vld [vmem:[%s10939_s1 + $0x8e0] sm:$0xff] }
  0xe8   :  { %5334 = vmatpush.bf16.msrb.mxu3 %v8586_v63  ;;  %v9770_v22 = vadd.f32 %v5082_v19, %v5070_v17  ;;  %v30_v17 = vld [vmem:[%s10940_s0 + $0x48] sm:$0xff] }
  0xe9   :  { %5308 = vmatpush.bf16.msrb.mxu1 %v8570_v0  ;;  %v5058_v25 = vpop.f32.mrf.mxu1  ;;  %v8613_v19 = vld [vmem:[%s10939_s1 + $0x8c8] sm:$0xff]  ;;  %101 = vst [vmem:[#allocation1 + $0x20] ss:$4 sm:$0xff] %v30_v17  ;;  %v8659_v17 = vld [vmem:[%s10939_s1 + $0xa38] sm:$0xff] }
  0xea   :  { %5296 = vmatpush.bf16.msrb.mxu0 %v8561_v1  ;;  %v8600_v1 = vld [vmem:[%s10939_s1 + $0x860] sm:$0xff] }
  0xeb   :  { %5322 = vmatpush.bf16.msrb.mxu2 %v8577_v2  ;;  %v8591_v2 = vld [vmem:[%s10939_s1 + $0x818] sm:$0xff]  ;;  %v8612_v25 = vld [vmem:[%s10939_s1 + $0x8c0] sm:$0xff] }
  0xec   :  { %5335 = vmatpush.bf16.msrb.mxu3 %v8585_v3  ;;  %v8607_v3 = vld [vmem:[%s10939_s1 + $0x898] sm:$0xff] }
  0xed   :  { %5309 = vmatpush.bf16.msrb.mxu1 %v8569_v4  ;;  %v5071_v31 = vpop.f32.mrf.mxu2  ;;  %v8615_v4 = vld [vmem:[%s10939_s1 + $0x8d8] sm:$0xff] }
  0xee   :  { %5297 = vmatpush.bf16.msrb.mxu0 %v8560_v7  ;;  %v5084_v33 = vpop.f32.mrf.mxu3  ;;  %v8651_v31 = vld [vmem:[%s10939_s1 + $0x9f8] sm:$0xff] }
  0xef   :  { %5323 = vmatpush.bf16.msrb.mxu2 %v8576_v8  ;;  %v8599_v8 = vld [vmem:[%s10939_s1 + $0x858] sm:$0xff]  ;;  %v103_v33 = vld.sshfl [vmem:[#allocation1 + $0x8] sm:$0xff pattern:$0x73625140] }
  0xf0   :  { %5336 = vmatpush.bf16.msrb.mxu3 %v8584_v9  ;;  %v258_v38 = vpack.c.bf16 %v103_v33, %v103_v33  ;;  %v8673_v33 = vld [vmem:[%s10939_s1 + $0xaa8] sm:$0xff] }
  0xf1   :  { %5310 = vmatpush.bf16.msrb.mxu1 %v8568_v12  ;;  %v8606_v12 = vld [vmem:[%s10939_s1 + $0x890] sm:$0xff] }
  0xf2   :  { %5298 = vmatpush.bf16.msrb.mxu0 %v8559_v13  ;;  %v8614_v13 = vld [vmem:[%s10939_s1 + $0x8d0] sm:$0xff] }
  0xf3   :  { %5324 = vmatpush.bf16.msrb.mxu2 %v8575_v14 }
  0xf4   :  { %5337 = vmatpush.bf16.msrb.mxu3 %v8583_v15  ;;  %v8598_v15 = vld [vmem:[%s10939_s1 + $0x850] sm:$0xff] }
  0xf5   :  { %5311 = vmatpush.bf16.msrb.mxu1 %v8567_v18  ;;  %v8605_v18 = vld [vmem:[%s10939_s1 + $0x888] sm:$0xff] }
  0xf6   :  { %5299 = vmatpush.bf16.msrb.mxu0 %v8558_v21 }
  0xf7   :  { %5325 = vmatpush.bf16.msrb.mxu2 %v8574_v23  ;;  %v8588_v23 = vld [vmem:[%s10939_s1 + $0x800] sm:$0xff] }
  0xf8   :  { %5338 = vmatpush.bf16.msrb.mxu3 %v8582_v24  ;;  %v8604_v24 = vld [vmem:[%s10939_s1 + $0x880] sm:$0xff] }
  0xf9   :  { %5312 = vmatpush.bf16.msrb.mxu1 %v8566_v26  ;;  %v102_v26 = vld.sshfl [vmem:[#allocation1] sm:$0xff pattern:$0x73625140] }
  0xfa   :  { %5300 = vmatpush.bf16.msrb.mxu0 %v8557_v27  ;;  %v104_v27 = vld.sshfl [vmem:[#allocation1 + $0x10] sm:$0xff pattern:$0x73625140] }
  0xfb   :  { %5326 = vmatpush.bf16.msrb.mxu2 %v8573_v29  ;;  %v8643_v29 = vld [vmem:[%s10939_s1 + $0x9b8] sm:$0xff] }
  0xfc   :  { %5339 = vmatpush.bf16.msrb.mxu3 %v8581_v30  ;;  %v105_v30 = vld.sshfl [vmem:[#allocation1 + $0x18] sm:$0xff pattern:$0x73625140] }
  0xfd   :  { %5313 = vmatpush.bf16.msrb.mxu1 %v8565_v32  ;;  %v8596_v32 = vld [vmem:[%s10939_s1 + $0x840] sm:$0xff]  ;;  %v260_v37 = vpack.c.bf16 %v105_v30, %v105_v30  ;;  %v8682_v30 = vld [vmem:[%s10939_s1 + $0xaf0] sm:$0xff] }
  0xfe   :  { %5301 = vmatpush.bf16.msrb.mxu0 %v8556_v34  ;;  %v5095_v58 = vpop.f32.mrf.mxu0  ;;  %v257_v34 = vpack.c.bf16 %v102_v26, %v102_v26 }
  0xff   :  { %5327 = vmatpush.bf16.msrb.mxu2 %v8572_v35  ;;  %v5096_v59 = vadd.f32 %v5095_v58, %v9770_v22  ;;  %v8597_v22 = vld [vmem:[%s10939_s1 + $0x848] sm:$0xff]  ;;  %v259_v35 = vpack.c.bf16 %v104_v27, %v104_v27 }
 0x100   :  { %5340 = vmatpush.bf16.msrb.mxu3 %v8580_v36  ;;  %v8635_v36 = vld [vmem:[%s10939_s1 + $0x978] sm:$0xff] }
 0x101   :  { %5314 = vmatpush.bf16.msrb.mxu1 %v8564_v43  ;;  %5302 = vmatmul.bf16.vlgmr.msrb.gmra.mxu0 %v253_v45  ;;  %v5108_v63 = vpop.f32.mrf.mxu1  ;;  %v8625_v43 = vld [vmem:[%s10939_s1 + $0x928] sm:$0xff] }
 0x102   :  { %5346 = vmatpush.bf16.msra.mxu0 %v8595_v39  ;;  %5328 = vmatmul.bf16.vlgmr.msrb.gmra.mxu2 %v255_v46  ;;  %v5109_v0 = vadd.f32 %v5108_v63, %v5096_v59  ;;  %v8626_v39 = vld [vmem:[%s10939_s1 + $0x930] sm:$0xff]  ;;  %v8649_v45 = vld [vmem:[%s10939_s1 + $0x9e8] sm:$0xff] }
 0x103   :  { %5372 = vmatpush.bf16.msra.mxu2 %v8611_v40  ;;  %5341 = vmatmul.bf16.vlgmr.msrb.gmra.mxu3 %v256_v48  ;;  %v8642_v40 = vld [vmem:[%s10939_s1 + $0x9b0] sm:$0xff]  ;;  %v8633_v46 = vld [vmem:[%s10939_s1 + $0x968] sm:$0xff] }
 0x104   :  { %5385 = vmatpush.bf16.msra.mxu3 %v8619_v42  ;;  %5315 = vmatmul.bf16.vlgmr.msrb.gmra.mxu1 %v254_v49  ;;  %v8634_v42 = vld [vmem:[%s10939_s1 + $0x970] sm:$0xff]  ;;  %v8624_v49 = vld [vmem:[%s10939_s1 + $0x920] sm:$0xff] }
 0x105   :  { %5359 = vmatpush.bf16.msra.mxu1 %v8603_v47  ;;  %v5121_v5 = vpop.f32.mrf.mxu2 }
 0x106   :  { %5347 = vmatpush.bf16.msra.mxu0 %v8594_v50  ;;  %v5122_v6 = vadd.f32 %v5121_v5, %v5109_v0  ;;  %v5134_v7 = vpop.f32.mrf.mxu3  ;;  %v5097_v9 = vpop.f32.mrf.mxu0  ;;  %v8640_v50 = vld [vmem:[%s10939_s1 + $0x9a0] sm:$0xff]  ;;  %v8622_v0 = vld [vmem:[%s10939_s1 + $0x910] sm:$0xff]  ;;  %v8621_v5 = vld [vmem:[%s10939_s1 + $0x908] sm:$0xff] }
 0x107   :  { %5373 = vmatpush.bf16.msra.mxu2 %v8610_v51  ;;  %v8648_v51 = vld [vmem:[%s10939_s1 + $0x9e0] sm:$0xff] }
 0x108   :  { %5386 = vmatpush.bf16.msra.mxu3 %v8618_v52  ;;  %v9869_v10 = vadd.f32 %v5134_v7, %v5122_v6  ;;  %v31_v6 = vld [vmem:[%s10940_s0 + $0x50] sm:$0xff]  ;;  %v8637_v7 = vld [vmem:[%s10939_s1 + $0x988] sm:$0xff] }
 0x109   :  { %5360 = vmatpush.bf16.msra.mxu1 %v8602_v53  ;;  %v5110_v14 = vpop.f32.mrf.mxu1  ;;  %110 = vst [vmem:[#allocation1] ss:$4 sm:$0xff] %v31_v6  ;;  %v8691_v6 = vld [vmem:[%s10939_s1 + $0xb38] sm:$0xff] }
 0x10a   :  { %5348 = vmatpush.bf16.msra.mxu0 %v8593_v54  ;;  %v8632_v54 = vld [vmem:[%s10939_s1 + $0x960] sm:$0xff] }
 0x10b   :  { %5374 = vmatpush.bf16.msra.mxu2 %v8609_v55  ;;  %v8623_v55 = vld [vmem:[%s10939_s1 + $0x918] sm:$0xff]  ;;  %v8644_v14 = vld [vmem:[%s10939_s1 + $0x9c0] sm:$0xff] }
 0x10c   :  { %5387 = vmatpush.bf16.msra.mxu3 %v8617_v56  ;;  %v8639_v56 = vld [vmem:[%s10939_s1 + $0x998] sm:$0xff] }
 0x10d   :  { %5361 = vmatpush.bf16.msra.mxu1 %v8601_v57  ;;  %v5123_v20 = vpop.f32.mrf.mxu2  ;;  %v8647_v57 = vld [vmem:[%s10939_s1 + $0x9d8] sm:$0xff] }
 0x10e   :  { %5349 = vmatpush.bf16.msra.mxu0 %v8592_v60  ;;  %v5136_v21 = vpop.f32.mrf.mxu3  ;;  %v8683_v20 = vld [vmem:[%s10939_s1 + $0xaf8] sm:$0xff] }
 0x10f   :  { %5375 = vmatpush.bf16.msra.mxu2 %v8608_v61  ;;  %v8631_v61 = vld [vmem:[%s10939_s1 + $0x958] sm:$0xff]  ;;  %v8628_v21 = vld [vmem:[%s10939_s1 + $0x940] sm:$0xff] }
 0x110   :  { %5388 = vmatpush.bf16.msra.mxu3 %v8616_v62 }
 0x111   :  { %5362 = vmatpush.bf16.msra.mxu1 %v8600_v1  ;;  %v8638_v1 = vld [vmem:[%s10939_s1 + $0x990] sm:$0xff] }
 0x112   :  { %5350 = vmatpush.bf16.msra.mxu0 %v8591_v2  ;;  %v8646_v2 = vld [vmem:[%s10939_s1 + $0x9d0] sm:$0xff] }
 0x113   :  { %5376 = vmatpush.bf16.msra.mxu2 %v8607_v3 }
 0x114   :  { %5389 = vmatpush.bf16.msra.mxu3 %v8615_v4  ;;  %v8630_v4 = vld [vmem:[%s10939_s1 + $0x950] sm:$0xff] }
 0x115   :  { %5363 = vmatpush.bf16.msra.mxu1 %v8599_v8  ;;  %v8645_v8 = vld [vmem:[%s10939_s1 + $0x9c8] sm:$0xff] }
 0x116   :  { %5351 = vmatpush.bf16.msra.mxu0 %v8590_v11  ;;  %v8629_v11 = vld [vmem:[%s10939_s1 + $0x948] sm:$0xff] }
 0x117   :  { %5377 = vmatpush.bf16.msra.mxu2 %v8606_v12  ;;  %v8620_v12 = vld [vmem:[%s10939_s1 + $0x900] sm:$0xff] }
 0x118   :  { %5390 = vmatpush.bf16.msra.mxu3 %v8614_v13  ;;  %v8636_v13 = vld [vmem:[%s10939_s1 + $0x980] sm:$0xff] }
 0x119   :  { %5364 = vmatpush.bf16.msra.mxu1 %v8598_v15  ;;  %v106_v15 = vld.sshfl [vmem:[#allocation1 + $0x20] sm:$0xff pattern:$0x73625140] }
 0x11a   :  { %5352 = vmatpush.bf16.msra.mxu0 %v8589_v16  ;;  %v108_v16 = vld.sshfl [vmem:[#allocation1 + $0x30] sm:$0xff pattern:$0x73625140] }
 0x11b   :  { %5378 = vmatpush.bf16.msra.mxu2 %v8605_v18  ;;  %v8675_v18 = vld [vmem:[%s10939_s1 + $0xab8] sm:$0xff] }
 0x11c   :  { %5391 = vmatpush.bf16.msra.mxu3 %v8613_v19  ;;  %v109_v19 = vld.sshfl [vmem:[#allocation1 + $0x38] sm:$0xff pattern:$0x73625140] }
 0x11d   :  { %5365 = vmatpush.bf16.msra.mxu1 %v8597_v22  ;;  %v107_v22 = vld.sshfl [vmem:[#allocation1 + $0x28] sm:$0xff pattern:$0x73625140]  ;;  %v264_v26 = vpack.c.bf16 %v109_v19, %v109_v19  ;;  %v8714_v19 = vld [vmem:[%s10939_s1 + $0xbf0] sm:$0xff] }
 0x11e   :  { %5353 = vmatpush.bf16.msra.mxu0 %v8588_v23  ;;  %v5147_v47 = vpop.f32.mrf.mxu0  ;;  %v261_v23 = vpack.c.bf16 %v106_v15, %v106_v15  ;;  %v262_v27 = vpack.c.bf16 %v107_v22, %v107_v22  ;;  %v8705_v22 = vld [vmem:[%s10939_s1 + $0xba8] sm:$0xff] }
 0x11f   :  { %5379 = vmatpush.bf16.msra.mxu2 %v8604_v24  ;;  %v5148_v48 = vadd.f32 %v5147_v47, %v9869_v10  ;;  %v263_v24 = vpack.c.bf16 %v108_v16, %v108_v16 }
 0x120   :  { %5392 = vmatpush.bf16.msra.mxu3 %v8612_v25  ;;  %v8667_v25 = vld [vmem:[%s10939_s1 + $0xa78] sm:$0xff] }
 0x121   :  { %5366 = vmatpush.bf16.msra.mxu1 %v8596_v32  ;;  %5354 = vmatmul.bf16.vlgmr.msra.gmra.mxu0 %v257_v34  ;;  %v5160_v52 = vpop.f32.mrf.mxu1  ;;  %v8657_v32 = vld [vmem:[%s10939_s1 + $0xa28] sm:$0xff] }
 0x122   :  { %5398 = vmatpush.bf16.msrb.mxu0 %v8627_v28  ;;  %5380 = vmatmul.bf16.vlgmr.msra.gmra.mxu2 %v259_v35  ;;  %v5161_v53 = vadd.f32 %v5160_v52, %v5148_v48  ;;  %v8658_v28 = vld [vmem:[%s10939_s1 + $0xa30] sm:$0xff]  ;;  %v8681_v34 = vld [vmem:[%s10939_s1 + $0xae8] sm:$0xff] }
 0x123   :  { %5424 = vmatpush.bf16.msrb.mxu2 %v8643_v29  ;;  %5393 = vmatmul.bf16.vlgmr.msra.gmra.mxu3 %v260_v37  ;;  %v8674_v29 = vld [vmem:[%s10939_s1 + $0xab0] sm:$0xff]  ;;  %v8665_v35 = vld [vmem:[%s10939_s1 + $0xa68] sm:$0xff] }
 0x124   :  { %5437 = vmatpush.bf16.msrb.mxu3 %v8651_v31  ;;  %5367 = vmatmul.bf16.vlgmr.msra.gmra.mxu1 %v258_v38  ;;  %v8666_v31 = vld [vmem:[%s10939_s1 + $0xa70] sm:$0xff]  ;;  %v8656_v38 = vld [vmem:[%s10939_s1 + $0xa20] sm:$0xff] }
 0x125   :  { %5411 = vmatpush.bf16.msrb.mxu1 %v8635_v36  ;;  %v5173_v58 = vpop.f32.mrf.mxu2 }
 0x126   :  { %5399 = vmatpush.bf16.msrb.mxu0 %v8626_v39  ;;  %v5174_v59 = vadd.f32 %v5173_v58, %v5161_v53  ;;  %v5186_v60 = vpop.f32.mrf.mxu3  ;;  %v5149_v62 = vpop.f32.mrf.mxu0  ;;  %v8672_v39 = vld [vmem:[%s10939_s1 + $0xaa0] sm:$0xff]  ;;  %v8654_v53 = vld [vmem:[%s10939_s1 + $0xa10] sm:$0xff]  ;;  %v8653_v58 = vld [vmem:[%s10939_s1 + $0xa08] sm:$0xff] }
 0x127   :  { %5425 = vmatpush.bf16.msrb.mxu2 %v8642_v40  ;;  %v8680_v40 = vld [vmem:[%s10939_s1 + $0xae0] sm:$0xff] }
 0x128   :  { %5438 = vmatpush.bf16.msrb.mxu3 %v8650_v41  ;;  %v9971_v63 = vadd.f32 %v5186_v60, %v5174_v59  ;;  %v32_v59 = vld [vmem:[%s10940_s0 + $0x58] sm:$0xff]  ;;  %v8669_v60 = vld [vmem:[%s10939_s1 + $0xa88] sm:$0xff] }
 0x129   :  { %5412 = vmatpush.bf16.msrb.mxu1 %v8634_v42  ;;  %v5162_v3 = vpop.f32.mrf.mxu1  ;;  %111 = vst [vmem:[#allocation1 + $0x20] ss:$4 sm:$0xff] %v32_v59  ;;  %v8723_v59 = vld [vmem:[%s10939_s1 + $0xc38] sm:$0xff] }
 0x12a   :  { %5400 = vmatpush.bf16.msrb.mxu0 %v8625_v43  ;;  %v8664_v43 = vld [vmem:[%s10939_s1 + $0xa60] sm:$0xff] }
 0x12b   :  { %5426 = vmatpush.bf16.msrb.mxu2 %v8641_v44  ;;  %v8655_v44 = vld [vmem:[%s10939_s1 + $0xa18] sm:$0xff]  ;;  %v8676_v3 = vld [vmem:[%s10939_s1 + $0xac0] sm:$0xff] }
 0x12c   :  { %5439 = vmatpush.bf16.msrb.mxu3 %v8649_v45  ;;  %v8671_v45 = vld [vmem:[%s10939_s1 + $0xa98] sm:$0xff] }
 0x12d   :  { %5413 = vmatpush.bf16.msrb.mxu1 %v8633_v46  ;;  %v5175_v9 = vpop.f32.mrf.mxu2  ;;  %v8679_v46 = vld [vmem:[%s10939_s1 + $0xad8] sm:$0xff] }
 0x12e   :  { %5401 = vmatpush.bf16.msrb.mxu0 %v8624_v49  ;;  %v5188_v10 = vpop.f32.mrf.mxu3  ;;  %v8715_v9 = vld [vmem:[%s10939_s1 + $0xbf8] sm:$0xff] }
 0x12f   :  { %5427 = vmatpush.bf16.msrb.mxu2 %v8640_v50  ;;  %v8663_v50 = vld [vmem:[%s10939_s1 + $0xa58] sm:$0xff]  ;;  %v8660_v10 = vld [vmem:[%s10939_s1 + $0xa40] sm:$0xff] }
 0x130   :  { %5440 = vmatpush.bf16.msrb.mxu3 %v8648_v51 }
 0x131   :  { %5414 = vmatpush.bf16.msrb.mxu1 %v8632_v54  ;;  %v8670_v54 = vld [vmem:[%s10939_s1 + $0xa90] sm:$0xff] }
 0x132   :  { %5402 = vmatpush.bf16.msrb.mxu0 %v8623_v55  ;;  %v8678_v55 = vld [vmem:[%s10939_s1 + $0xad0] sm:$0xff] }
 0x133   :  { %5428 = vmatpush.bf16.msrb.mxu2 %v8639_v56 }
 0x134   :  { %5441 = vmatpush.bf16.msrb.mxu3 %v8647_v57  ;;  %v8662_v57 = vld [vmem:[%s10939_s1 + $0xa50] sm:$0xff] }
 0x135   :  { %5415 = vmatpush.bf16.msrb.mxu1 %v8631_v61  ;;  %v8677_v61 = vld [vmem:[%s10939_s1 + $0xac8] sm:$0xff] }
 0x136   :  { %5403 = vmatpush.bf16.msrb.mxu0 %v8622_v0  ;;  %v8661_v0 = vld [vmem:[%s10939_s1 + $0xa48] sm:$0xff] }
 0x137   :  { %5429 = vmatpush.bf16.msrb.mxu2 %v8638_v1  ;;  %v8652_v1 = vld [vmem:[%s10939_s1 + $0xa00] sm:$0xff] }
 0x138   :  { %5442 = vmatpush.bf16.msrb.mxu3 %v8646_v2  ;;  %v8668_v2 = vld [vmem:[%s10939_s1 + $0xa80] sm:$0xff] }
 0x139   :  { %5416 = vmatpush.bf16.msrb.mxu1 %v8630_v4  ;;  %v112_v4 = vld.sshfl [vmem:[#allocation1] sm:$0xff pattern:$0x73625140] }
 0x13a   :  { %5404 = vmatpush.bf16.msrb.mxu0 %v8621_v5  ;;  %v114_v5 = vld.sshfl [vmem:[#allocation1 + $0x10] sm:$0xff pattern:$0x73625140] }
 0x13b   :  { %5430 = vmatpush.bf16.msrb.mxu2 %v8637_v7  ;;  %v8707_v7 = vld [vmem:[%s10939_s1 + $0xbb8] sm:$0xff] }
 0x13c   :  { %5443 = vmatpush.bf16.msrb.mxu3 %v8645_v8  ;;  %v115_v8 = vld.sshfl [vmem:[#allocation1 + $0x18] sm:$0xff pattern:$0x73625140] }
 0x13d   :  { %5417 = vmatpush.bf16.msrb.mxu1 %v8629_v11  ;;  %v113_v11 = vld.sshfl [vmem:[#allocation1 + $0x8] sm:$0xff pattern:$0x73625140]  ;;  %v268_v15 = vpack.c.bf16 %v115_v8, %v115_v8 }
 0x13e   :  { %5405 = vmatpush.bf16.msrb.mxu0 %v8620_v12  ;;  %v5199_v36 = vpop.f32.mrf.mxu0  ;;  %v265_v12 = vpack.c.bf16 %v112_v4, %v112_v4  ;;  %v266_v16 = vpack.c.bf16 %v113_v11, %v113_v11  ;;  %v8731_v4 = vld [vmem:[%s10939_s1 + $0xc78] sm:$0xff] }
 0x13f   :  { %5431 = vmatpush.bf16.msrb.mxu2 %v8636_v13  ;;  %v5200_v37 = vadd.f32 %v5199_v36, %v9971_v63  ;;  %v267_v13 = vpack.c.bf16 %v114_v5, %v114_v5  ;;  %v8722_v5 = vld [vmem:[%s10939_s1 + $0xc30] sm:$0xff] }
 0x140   :  { %5444 = vmatpush.bf16.msrb.mxu3 %v8644_v14  ;;  %v8699_v14 = vld [vmem:[%s10939_s1 + $0xb78] sm:$0xff] }
 0x141   :  { %5418 = vmatpush.bf16.msrb.mxu1 %v8628_v21  ;;  %5406 = vmatmul.bf16.vlgmr.msrb.gmra.mxu0 %v261_v23  ;;  %v5212_v41 = vpop.f32.mrf.mxu1  ;;  %v8689_v21 = vld [vmem:[%s10939_s1 + $0xb28] sm:$0xff] }
 0x142   :  { %5450 = vmatpush.bf16.msra.mxu0 %v8659_v17  ;;  %5432 = vmatmul.bf16.vlgmr.msrb.gmra.mxu2 %v263_v24  ;;  %v5213_v42 = vadd.f32 %v5212_v41, %v5200_v37  ;;  %v8690_v17 = vld [vmem:[%s10939_s1 + $0xb30] sm:$0xff]  ;;  %v8713_v23 = vld [vmem:[%s10939_s1 + $0xbe8] sm:$0xff] }
 0x143   :  { %5476 = vmatpush.bf16.msra.mxu2 %v8675_v18  ;;  %5445 = vmatmul.bf16.vlgmr.msrb.gmra.mxu3 %v264_v26  ;;  %v8706_v18 = vld [vmem:[%s10939_s1 + $0xbb0] sm:$0xff]  ;;  %v8697_v24 = vld [vmem:[%s10939_s1 + $0xb68] sm:$0xff] }
 0x144   :  { %5489 = vmatpush.bf16.msra.mxu3 %v8683_v20  ;;  %5419 = vmatmul.bf16.vlgmr.msrb.gmra.mxu1 %v262_v27  ;;  %v8698_v20 = vld [vmem:[%s10939_s1 + $0xb70] sm:$0xff]  ;;  %v8688_v27 = vld [vmem:[%s10939_s1 + $0xb20] sm:$0xff] }
 0x145   :  { %5463 = vmatpush.bf16.msra.mxu1 %v8667_v25  ;;  %v5225_v47 = vpop.f32.mrf.mxu2 }
 0x146   :  { %5451 = vmatpush.bf16.msra.mxu0 %v8658_v28  ;;  %v5226_v48 = vadd.f32 %v5225_v47, %v5213_v42  ;;  %v5238_v49 = vpop.f32.mrf.mxu3  ;;  %v5201_v51 = vpop.f32.mrf.mxu0  ;;  %v8704_v28 = vld [vmem:[%s10939_s1 + $0xba0] sm:$0xff]  ;;  %v8686_v42 = vld [vmem:[%s10939_s1 + $0xb10] sm:$0xff]  ;;  %v8685_v47 = vld [vmem:[%s10939_s1 + $0xb08] sm:$0xff] }
 0x147   :  { %5477 = vmatpush.bf16.msra.mxu2 %v8674_v29  ;;  %v8712_v29 = vld [vmem:[%s10939_s1 + $0xbe0] sm:$0xff] }
 0x148   :  { %5490 = vmatpush.bf16.msra.mxu3 %v8682_v30  ;;  %v10073_v52 = vadd.f32 %v5238_v49, %v5226_v48  ;;  %v33_v48 = vld [vmem:[%s10940_s0 + $0x60] sm:$0xff]  ;;  %v8701_v49 = vld [vmem:[%s10939_s1 + $0xb88] sm:$0xff] }
 0x149   :  { %5464 = vmatpush.bf16.msra.mxu1 %v8666_v31  ;;  %v5214_v56 = vpop.f32.mrf.mxu1  ;;  %120 = vst [vmem:[#allocation1] ss:$4 sm:$0xff] %v33_v48  ;;  %v8716_v48 = vld [vmem:[%s10939_s1 + $0xc00] sm:$0xff] }
 0x14a   :  { %5452 = vmatpush.bf16.msra.mxu0 %v8657_v32  ;;  %v8696_v32 = vld [vmem:[%s10939_s1 + $0xb60] sm:$0xff] }
 0x14b   :  { %5478 = vmatpush.bf16.msra.mxu2 %v8673_v33  ;;  %v8687_v33 = vld [vmem:[%s10939_s1 + $0xb18] sm:$0xff]  ;;  %v8708_v56 = vld [vmem:[%s10939_s1 + $0xbc0] sm:$0xff] }
 0x14c   :  { %5491 = vmatpush.bf16.msra.mxu3 %v8681_v34  ;;  %v8703_v34 = vld [vmem:[%s10939_s1 + $0xb98] sm:$0xff] }
 0x14d   :  { %5465 = vmatpush.bf16.msra.mxu1 %v8665_v35  ;;  %v5227_v62 = vpop.f32.mrf.mxu2  ;;  %v8711_v35 = vld [vmem:[%s10939_s1 + $0xbd8] sm:$0xff] }
 0x14e   :  { %5453 = vmatpush.bf16.msra.mxu0 %v8656_v38  ;;  %v5240_v63 = vpop.f32.mrf.mxu3  ;;  %v8747_v62 = vld [vmem:[%s10939_s1 + $0xcf8] sm:$0xff] }
 0x14f   :  { %5479 = vmatpush.bf16.msra.mxu2 %v8672_v39  ;;  %v8695_v39 = vld [vmem:[%s10939_s1 + $0xb58] sm:$0xff]  ;;  %v8692_v63 = vld [vmem:[%s10939_s1 + $0xb40] sm:$0xff] }
 0x150   :  { %5492 = vmatpush.bf16.msra.mxu3 %v8680_v40  ;;  %v10236_v8 = vld.sshfl [vmem:[#allocation1 + $0x10] sm:$0xff pattern:$0x73625140]  ;;  %v10240_v11 = vld.sshfl [vmem:[#allocation1 + $0x18] sm:$0xff pattern:$0x73625140] }
 0x151   :  { %5466 = vmatpush.bf16.msra.mxu1 %v8664_v43  ;;  %v8702_v43 = vld [vmem:[%s10939_s1 + $0xb90] sm:$0xff] }
 0x152   :  { %5454 = vmatpush.bf16.msra.mxu0 %v8655_v44  ;;  %v8710_v44 = vld [vmem:[%s10939_s1 + $0xbd0] sm:$0xff] }
 0x153   :  { %5480 = vmatpush.bf16.msra.mxu2 %v8671_v45 }
 0x154   :  { %5493 = vmatpush.bf16.msra.mxu3 %v8679_v46  ;;  %v8694_v46 = vld [vmem:[%s10939_s1 + $0xb50] sm:$0xff] }
 0x155   :  { %5467 = vmatpush.bf16.msra.mxu1 %v8663_v50  ;;  %v8709_v50 = vld [vmem:[%s10939_s1 + $0xbc8] sm:$0xff] }
 0x156   :  { %5455 = vmatpush.bf16.msra.mxu0 %v8654_v53  ;;  %v8693_v53 = vld [vmem:[%s10939_s1 + $0xb48] sm:$0xff] }
 0x157   :  { %5481 = vmatpush.bf16.msra.mxu2 %v8670_v54  ;;  %v8684_v54 = vld [vmem:[%s10939_s1 + $0xb00] sm:$0xff] }
 0x158   :  { %5494 = vmatpush.bf16.msra.mxu3 %v8678_v55  ;;  %v8700_v55 = vld [vmem:[%s10939_s1 + $0xb80] sm:$0xff] }
 0x159   :  { %5468 = vmatpush.bf16.msra.mxu1 %v8662_v57  ;;  %v116_v57 = vld.sshfl [vmem:[#allocation1 + $0x20] sm:$0xff pattern:$0x73625140] }
 0x15a   :  { %5456 = vmatpush.bf16.msra.mxu0 %v8653_v58  ;;  %v118_v58 = vld.sshfl [vmem:[#allocation1 + $0x30] sm:$0xff pattern:$0x73625140] }
 0x15b   :  { %5482 = vmatpush.bf16.msra.mxu2 %v8669_v60  ;;  %v8739_v60 = vld [vmem:[%s10939_s1 + $0xcb8] sm:$0xff] }
 0x15c   :  { %5495 = vmatpush.bf16.msra.mxu3 %v8677_v61  ;;  %v119_v61 = vld.sshfl [vmem:[#allocation1 + $0x38] sm:$0xff pattern:$0x73625140] }
 0x15d   :  { %5469 = vmatpush.bf16.msra.mxu1 %v8661_v0  ;;  %v117_v0 = vld.sshfl [vmem:[#allocation1 + $0x28] sm:$0xff pattern:$0x73625140] }
 0x15e   :  { %5457 = vmatpush.bf16.msra.mxu0 %v8652_v1  ;;  %v5251_v25 = vpop.f32.mrf.mxu0  ;;  %v35_v1 = vld [vmem:[%s10940_s0 + $0x70] sm:$0xff] }
 0x15f   :  { %5483 = vmatpush.bf16.msra.mxu2 %v8668_v2  ;;  %v5252_v26 = vadd.f32 %v5251_v25, %v10073_v52  ;;  %v269_v2 = vpack.c.bf16 %v116_v57, %v116_v57  ;;  %v275_v57 = vpack.c.bf16 %v10236_v8, %v10236_v8  ;;  %v8761_v8 = vld [vmem:[%s10939_s1 + $0xd68] sm:$0xff] }
 0x160   :  { %5496 = vmatpush.bf16.msra.mxu3 %v8676_v3  ;;  %v271_v3 = vpack.c.bf16 %v118_v58, %v118_v58  ;;  %v8763_v58 = vld [vmem:[%s10939_s1 + $0xd78] sm:$0xff] }
 0x161   :  { %5470 = vmatpush.bf16.msra.mxu1 %v8660_v10  ;;  %5458 = vmatmul.bf16.vlgmr.msra.gmra.mxu0 %v265_v12  ;;  %v5264_v30 = vpop.f32.mrf.mxu1  ;;  %v10238_v10 = vld.sshfl [vmem:[#allocation1 + $0x8] sm:$0xff pattern:$0x73625140]  ;;  %v8738_v12 = vld [vmem:[%s10939_s1 + $0xcb0] sm:$0xff] }
 0x162   :  { %5502 = vmatpush.bf16.msrb.mxu0 %v8691_v6  ;;  %5484 = vmatmul.bf16.vlgmr.msra.gmra.mxu2 %v267_v13  ;;  %v5265_v31 = vadd.f32 %v5264_v30, %v5252_v26  ;;  %v272_v6 = vpack.c.bf16 %v119_v61, %v119_v61  ;;  %v8746_v13 = vld [vmem:[%s10939_s1 + $0xcf0] sm:$0xff]  ;;  %v8728_v26 = vld [vmem:[%s10939_s1 + $0xc60] sm:$0xff] }
 0x163   :  { %5528 = vmatpush.bf16.msrb.mxu2 %v8707_v7  ;;  %5497 = vmatmul.bf16.vlgmr.msra.gmra.mxu3 %v268_v15  ;;  %v10234_v7 = vld.sshfl [vmem:[#allocation1] sm:$0xff pattern:$0x73625140]  ;;  %v8721_v15 = vld [vmem:[%s10939_s1 + $0xc28] sm:$0xff] }
 0x164   :  { %5541 = vmatpush.bf16.msrb.mxu3 %v8715_v9  ;;  %5471 = vmatmul.bf16.vlgmr.msra.gmra.mxu1 %v266_v16  ;;  %v270_v9 = vpack.c.bf16 %v117_v0, %v117_v0  ;;  %130 = vst [vmem:[#allocation1] ss:$4 sm:$0xff] %v35_v1  ;;  %v8737_v16 = vld [vmem:[%s10939_s1 + $0xca8] sm:$0xff] }
 0x165   :  { %5515 = vmatpush.bf16.msrb.mxu1 %v8699_v14  ;;  %v5277_v36 = vpop.f32.mrf.mxu2  ;;  %v8730_v14 = vld [vmem:[%s10939_s1 + $0xc70] sm:$0xff] }
 0x166   :  { %5503 = vmatpush.bf16.msrb.mxu0 %v8690_v17  ;;  %v5278_v37 = vadd.f32 %v5277_v36, %v5265_v31  ;;  %v5290_v38 = vpop.f32.mrf.mxu3  ;;  %v5253_v40 = vpop.f32.mrf.mxu0  ;;  %v8745_v17 = vld [vmem:[%s10939_s1 + $0xce8] sm:$0xff]  ;;  %v8718_v36 = vld [vmem:[%s10939_s1 + $0xc10] sm:$0xff] }
 0x167   :  { %5529 = vmatpush.bf16.msrb.mxu2 %v8706_v18  ;;  %v8729_v18 = vld [vmem:[%s10939_s1 + $0xc68] sm:$0xff]  ;;  %v8726_v40 = vld [vmem:[%s10939_s1 + $0xc50] sm:$0xff] }
 0x168   :  { %5542 = vmatpush.bf16.msrb.mxu3 %v8714_v19  ;;  %v10175_v41 = vadd.f32 %v5290_v38, %v5278_v37  ;;  %v8734_v37 = vld [vmem:[%s10939_s1 + $0xc90] sm:$0xff] }
 0x169   :  { %5516 = vmatpush.bf16.msrb.mxu1 %v8698_v20  ;;  %v5266_v45 = vpop.f32.mrf.mxu1  ;;  %v8742_v38 = vld [vmem:[%s10939_s1 + $0xcd0] sm:$0xff] }
 0x16a   :  { %5504 = vmatpush.bf16.msrb.mxu0 %v8689_v21  ;;  %v8720_v21 = vld [vmem:[%s10939_s1 + $0xc20] sm:$0xff] }
 0x16b   :  { %5530 = vmatpush.bf16.msrb.mxu2 %v8705_v22  ;;  %v8736_v22 = vld [vmem:[%s10939_s1 + $0xca0] sm:$0xff] }
 0x16c   :  { %5543 = vmatpush.bf16.msrb.mxu3 %v8713_v23  ;;  %v8744_v23 = vld [vmem:[%s10939_s1 + $0xce0] sm:$0xff] }
 0x16d   :  { %5517 = vmatpush.bf16.msrb.mxu1 %v8697_v24  ;;  %v5279_v51 = vpop.f32.mrf.mxu2 }
 0x16e   :  { %5505 = vmatpush.bf16.msrb.mxu0 %v8688_v27  ;;  %v5292_v52 = vpop.f32.mrf.mxu3  ;;  %v8719_v27 = vld [vmem:[%s10939_s1 + $0xc18] sm:$0xff] }
 0x16f   :  { %5531 = vmatpush.bf16.msrb.mxu2 %v8704_v28  ;;  %v8735_v28 = vld [vmem:[%s10939_s1 + $0xc98] sm:$0xff] }
 0x170   :  { %5544 = vmatpush.bf16.msrb.mxu3 %v8712_v29  ;;  %v8743_v29 = vld [vmem:[%s10939_s1 + $0xcd8] sm:$0xff] }
 0x171   :  { %5518 = vmatpush.bf16.msrb.mxu1 %v8696_v32  ;;  %v8755_v51 = vld [vmem:[%s10939_s1 + $0xd38] sm:$0xff] }
 0x172   :  { %5506 = vmatpush.bf16.msrb.mxu0 %v8687_v33  ;;  %v8727_v33 = vld [vmem:[%s10939_s1 + $0xc58] sm:$0xff] }
 0x173   :  { %5532 = vmatpush.bf16.msrb.mxu2 %v8703_v34  ;;  %v8771_v52 = vld [vmem:[%s10939_s1 + $0xdb8] sm:$0xff] }
 0x174   :  { %5545 = vmatpush.bf16.msrb.mxu3 %v8711_v35 }
 0x175   :  { %5519 = vmatpush.bf16.msrb.mxu1 %v8695_v39 }
 0x176   :  { %5507 = vmatpush.bf16.msrb.mxu0 %v8686_v42  ;;  %v34_v42 = vld [vmem:[%s10940_s0 + $0x68] sm:$0xff] }
 0x177   :  { %5533 = vmatpush.bf16.msrb.mxu2 %v8702_v43  ;;  %v8733_v43 = vld [vmem:[%s10939_s1 + $0xc88] sm:$0xff]  ;;  %121 = vst [vmem:[#allocation1 + $0x20] ss:$4 sm:$0xff] %v34_v42  ;;  %v8811_v42 = vld [vmem:[%s10939_s1 + $0xef8] sm:$0xff] }
 0x178   :  { %5546 = vmatpush.bf16.msrb.mxu3 %v8710_v44  ;;  %v8741_v44 = vld [vmem:[%s10939_s1 + $0xcc8] sm:$0xff] }
 0x179   :  { %5520 = vmatpush.bf16.msrb.mxu1 %v8694_v46 }
 0x17a   :  { %5508 = vmatpush.bf16.msrb.mxu0 %v8685_v47  ;;  %v8725_v47 = vld [vmem:[%s10939_s1 + $0xc48] sm:$0xff] }
 0x17b   :  { %5534 = vmatpush.bf16.msrb.mxu2 %v8701_v49  ;;  %v8732_v49 = vld [vmem:[%s10939_s1 + $0xc80] sm:$0xff] }
 0x17c   :  { %5547 = vmatpush.bf16.msrb.mxu3 %v8709_v50  ;;  %v8740_v50 = vld [vmem:[%s10939_s1 + $0xcc0] sm:$0xff] }
 0x17d   :  { %5521 = vmatpush.bf16.msrb.mxu1 %v8693_v53  ;;  %v8779_v53 = vld [vmem:[%s10939_s1 + $0xdf8] sm:$0xff] }
 0x17e   :  { %5509 = vmatpush.bf16.msrb.mxu0 %v8684_v54  ;;  %v5303_v19 = vpop.f32.mrf.mxu0  ;;  %v8724_v54 = vld [vmem:[%s10939_s1 + $0xc40] sm:$0xff]  ;;  %v10359_v0 = vld.sshfl [vmem:[#allocation1 + $0x28] sm:$0xff pattern:$0x73625140] }
 0x17f   :  { %5535 = vmatpush.bf16.msrb.mxu2 %v8700_v55  ;;  %v5304_v20 = vadd.f32 %v5303_v19, %v10175_v41  ;;  %v8717_v41 = vld [vmem:[%s10939_s1 + $0xc08] sm:$0xff]  ;;  %v36_v55 = vld [vmem:[%s10940_s0 + $0x78] sm:$0xff]  ;;  %v10353_v61 = vld.sshfl [vmem:[#allocation1 + $0x20] sm:$0xff pattern:$0x73625140] }
 0x180   :  { %5548 = vmatpush.bf16.msrb.mxu3 %v8708_v56  ;;  %v273_v56 = vpack.c.bf16 %v10234_v7, %v10234_v7  ;;  %v10361_v1 = vld.sshfl [vmem:[#allocation1 + $0x38] sm:$0xff pattern:$0x73625140]  ;;  %v8777_v7 = vld [vmem:[%s10939_s1 + $0xde8] sm:$0xff] }
 0x181   :  { %5522 = vmatpush.bf16.msrb.mxu1 %v8692_v63  ;;  %5510 = vmatmul.bf16.vlgmr.msrb.gmra.mxu0 %v269_v2  ;;  %v5316_v24 = vpop.f32.mrf.mxu1  ;;  %v274_v63 = vpack.c.bf16 %v10238_v10, %v10238_v10  ;;  %v8770_v2 = vld [vmem:[%s10939_s1 + $0xdb0] sm:$0xff]  ;;  %v8775_v19 = vld [vmem:[%s10939_s1 + $0xdd8] sm:$0xff] }
 0x182   :  { %5554 = vmatpush.bf16.msra.mxu0 %v8723_v59  ;;  %5536 = vmatmul.bf16.vlgmr.msrb.gmra.mxu2 %v271_v3  ;;  %v5317_v25 = vadd.f32 %v5316_v24, %v5304_v20  ;;  %v8754_v59 = vld [vmem:[%s10939_s1 + $0xd30] sm:$0xff] }
 0x183   :  { %5580 = vmatpush.bf16.msra.mxu2 %v8739_v60  ;;  %5549 = vmatmul.bf16.vlgmr.msrb.gmra.mxu3 %v272_v6  ;;  %v276_v60 = vpack.c.bf16 %v10240_v11, %v10240_v11  ;;  %v8778_v3 = vld [vmem:[%s10939_s1 + $0xdf0] sm:$0xff]  ;;  %v8769_v6 = vld [vmem:[%s10939_s1 + $0xda8] sm:$0xff]  ;;  %v8752_v11 = vld [vmem:[%s10939_s1 + $0xd20] sm:$0xff] }
 0x184   :  { %5593 = vmatpush.bf16.msra.mxu3 %v8747_v62  ;;  %5523 = vmatmul.bf16.vlgmr.msrb.gmra.mxu1 %v270_v9  ;;  %v10355_v62 = vld.sshfl [vmem:[#allocation1 + $0x30] sm:$0xff pattern:$0x73625140] }
 0x185   :  { %5567 = vmatpush.bf16.msra.mxu1 %v8731_v4  ;;  %v5329_v30 = vpop.f32.mrf.mxu2  ;;  %131 = vst [vmem:[#allocation1 + $0x20] ss:$4 sm:$0xff] %v36_v55  ;;  %v8762_v4 = vld [vmem:[%s10939_s1 + $0xd70] sm:$0xff] }
 0x186   :  { %5555 = vmatpush.bf16.msra.mxu0 %v8722_v5  ;;  %v5330_v31 = vadd.f32 %v5329_v30, %v5317_v25  ;;  %v5342_v32 = vpop.f32.mrf.mxu3  ;;  %v5305_v34 = vpop.f32.mrf.mxu0  ;;  %v8753_v5 = vld [vmem:[%s10939_s1 + $0xd28] sm:$0xff]  ;;  %v8758_v30 = vld [vmem:[%s10939_s1 + $0xd50] sm:$0xff] }
 0x187   :  { %5581 = vmatpush.bf16.msra.mxu2 %v8738_v12  ;;  %v8768_v12 = vld [vmem:[%s10939_s1 + $0xda0] sm:$0xff]  ;;  %v8802_v55 = vld [vmem:[%s10939_s1 + $0xeb0] sm:$0xff] }
 0x188   :  { %5594 = vmatpush.bf16.msra.mxu3 %v8746_v13  ;;  %v10288_v35 = vadd.f32 %v5342_v32, %v5330_v31  ;;  %v8776_v13 = vld [vmem:[%s10939_s1 + $0xde0] sm:$0xff]  ;;  %v8749_v31 = vld [vmem:[%s10939_s1 + $0xd08] sm:$0xff] }
 0x189   :  { %5568 = vmatpush.bf16.msra.mxu1 %v8730_v14  ;;  %v5318_v39 = vpop.f32.mrf.mxu1  ;;  %v8765_v32 = vld [vmem:[%s10939_s1 + $0xd88] sm:$0xff] }
 0x18a   :  { %5556 = vmatpush.bf16.msra.mxu0 %v8721_v15  ;;  %v8772_v39 = vld [vmem:[%s10939_s1 + $0xdc0] sm:$0xff] }
 0x18b   :  { %5582 = vmatpush.bf16.msra.mxu2 %v8737_v16  ;;  %v8760_v16 = vld [vmem:[%s10939_s1 + $0xd60] sm:$0xff] }
 0x18c   :  { %5595 = vmatpush.bf16.msra.mxu3 %v8745_v17  ;;  %v8751_v17 = vld [vmem:[%s10939_s1 + $0xd18] sm:$0xff] }
 0x18d   :  { %5569 = vmatpush.bf16.msra.mxu1 %v8729_v18  ;;  %v5331_v45 = vpop.f32.mrf.mxu2  ;;  %v8767_v18 = vld [vmem:[%s10939_s1 + $0xd98] sm:$0xff] }
 0x18e   :  { %5557 = vmatpush.bf16.msra.mxu0 %v8720_v21  ;;  %v5344_v46 = vpop.f32.mrf.mxu3  ;;  %v277_v45 = vpack.c.bf16 %v10353_v61, %v10353_v61  ;;  %v8793_v61 = vld [vmem:[%s10939_s1 + $0xe68] sm:$0xff] }
 0x18f   :  { %5583 = vmatpush.bf16.msra.mxu2 %v8736_v22  ;;  %v279_v46 = vpack.c.bf16 %v10355_v62, %v10355_v62 }
 0x190   :  { %5596 = vmatpush.bf16.msra.mxu3 %v8744_v23  ;;  %v8759_v23 = vld [vmem:[%s10939_s1 + $0xd58] sm:$0xff] }
 0x191   :  { %5570 = vmatpush.bf16.msra.mxu1 %v8728_v26  ;;  %v8750_v26 = vld [vmem:[%s10939_s1 + $0xd10] sm:$0xff] }
 0x192   :  { %5558 = vmatpush.bf16.msra.mxu0 %v8719_v27  ;;  %v8766_v27 = vld [vmem:[%s10939_s1 + $0xd90] sm:$0xff] }
 0x193   :  { %5584 = vmatpush.bf16.msra.mxu2 %v8735_v28  ;;  %v8774_v28 = vld [vmem:[%s10939_s1 + $0xdd0] sm:$0xff] }
 0x194   :  { %5597 = vmatpush.bf16.msra.mxu3 %v8743_v29 }
 0x195   :  { %5571 = vmatpush.bf16.msra.mxu1 %v8727_v33  ;;  %v8773_v33 = vld [vmem:[%s10939_s1 + $0xdc8] sm:$0xff] }
 0x196   :  { %5559 = vmatpush.bf16.msra.mxu0 %v8718_v36  ;;  %v8757_v36 = vld [vmem:[%s10939_s1 + $0xd48] sm:$0xff] }
 0x197   :  { %5585 = vmatpush.bf16.msra.mxu2 %v8734_v37  ;;  %v8748_v37 = vld [vmem:[%s10939_s1 + $0xd00] sm:$0xff] }
 0x198   :  { %5598 = vmatpush.bf16.msra.mxu3 %v8742_v38  ;;  %v8764_v38 = vld [vmem:[%s10939_s1 + $0xd80] sm:$0xff] }
 0x199   :  { %5572 = vmatpush.bf16.msra.mxu1 %v8726_v40  ;;  %v8787_v40 = vld [vmem:[%s10939_s1 + $0xe38] sm:$0xff] }
 0x19a   :  { %5560 = vmatpush.bf16.msra.mxu0 %v8717_v41  ;;  %v8803_v41 = vld [vmem:[%s10939_s1 + $0xeb8] sm:$0xff] }
 0x19b   :  { %5586 = vmatpush.bf16.msra.mxu2 %v8733_v43  ;;  %v8756_v43 = vld [vmem:[%s10939_s1 + $0xd40] sm:$0xff] }
 0x19c   :  { %5599 = vmatpush.bf16.msra.mxu3 %v8741_v44  ;;  %v37_v44 = vld [vmem:[%s10940_s0 + $0x80] sm:$0xff] }
 0x19d   :  { %5573 = vmatpush.bf16.msra.mxu1 %v8725_v47  ;;  %v8795_v47 = vld [vmem:[%s10939_s1 + $0xe78] sm:$0xff] }
 0x19e   :  { %5561 = vmatpush.bf16.msra.mxu0 %v8716_v48  ;;  %v5355_v9 = vpop.f32.mrf.mxu0  ;;  %v8786_v48 = vld [vmem:[%s10939_s1 + $0xe30] sm:$0xff] }
 0x19f   :  { %5587 = vmatpush.bf16.msra.mxu2 %v8732_v49  ;;  %v5356_v10 = vadd.f32 %v5355_v9, %v10288_v35  ;;  %v280_v49 = vpack.c.bf16 %v10361_v1, %v10361_v1  ;;  %v8800_v1 = vld [vmem:[%s10939_s1 + $0xea0] sm:$0xff] }
 0x1a0   :  { %5600 = vmatpush.bf16.msra.mxu3 %v8740_v50  ;;  %v10471_v50 = vld.sshfl [vmem:[#allocation1] sm:$0xff pattern:$0x73625140] }
 0x1a1   :  { %5574 = vmatpush.bf16.msra.mxu1 %v8724_v54  ;;  %5562 = vmatmul.bf16.vlgmr.msra.gmra.mxu0 %v273_v56  ;;  %v5368_v14 = vpop.f32.mrf.mxu1  ;;  %v10479_v54 = vld.sshfl [vmem:[#allocation1 + $0x18] sm:$0xff pattern:$0x73625140]  ;;  %v8810_v56 = vld [vmem:[%s10939_s1 + $0xef0] sm:$0xff] }
 0x1a2   :  { %5606 = vmatpush.bf16.msrb.mxu0 %v8755_v51  ;;  %5588 = vmatmul.bf16.vlgmr.msra.gmra.mxu2 %v275_v57  ;;  %v5369_v15 = vadd.f32 %v5368_v14, %v5356_v10  ;;  %v10473_v51 = vld.sshfl [vmem:[#allocation1 + $0x10] sm:$0xff pattern:$0x73625140] }
 0x1a3   :  { %5632 = vmatpush.bf16.msrb.mxu2 %v8771_v52  ;;  %5601 = vmatmul.bf16.vlgmr.msra.gmra.mxu3 %v276_v60  ;;  %v278_v52 = vpack.c.bf16 %v10359_v0, %v10359_v0  ;;  %v8794_v57 = vld [vmem:[%s10939_s1 + $0xe70] sm:$0xff]  ;;  %v8809_v60 = vld [vmem:[%s10939_s1 + $0xee8] sm:$0xff]  ;;  %v8784_v0 = vld [vmem:[%s10939_s1 + $0xe20] sm:$0xff] }
 0x1a4   :  { %5645 = vmatpush.bf16.msrb.mxu3 %v8779_v53  ;;  %5575 = vmatmul.bf16.vlgmr.msra.gmra.mxu1 %v274_v63  ;;  %v10477_v53 = vld.sshfl [vmem:[#allocation1 + $0x8] sm:$0xff pattern:$0x73625140] }
 0x1a5   :  { %5619 = vmatpush.bf16.msrb.mxu1 %v8763_v58  ;;  %v5381_v20 = vpop.f32.mrf.mxu2  ;;  %140 = vst [vmem:[#allocation1] ss:$4 sm:$0xff] %v37_v44  ;;  %v8785_v58 = vld [vmem:[%s10939_s1 + $0xe28] sm:$0xff]  ;;  %v8834_v44 = vld [vmem:[%s10939_s1 + $0xfb0] sm:$0xff] }
 0x1a6   :  { %5607 = vmatpush.bf16.msrb.mxu0 %v8754_v59  ;;  %v5382_v21 = vadd.f32 %v5381_v20, %v5369_v15  ;;  %v5394_v22 = vpop.f32.mrf.mxu3  ;;  %v5357_v24 = vpop.f32.mrf.mxu0  ;;  %v8801_v59 = vld [vmem:[%s10939_s1 + $0xea8] sm:$0xff]  ;;  %v8782_v15 = vld [vmem:[%s10939_s1 + $0xe10] sm:$0xff] }
 0x1a7   :  { %5633 = vmatpush.bf16.msrb.mxu2 %v8770_v2  ;;  %v8808_v2 = vld [vmem:[%s10939_s1 + $0xee0] sm:$0xff]  ;;  %v8781_v20 = vld [vmem:[%s10939_s1 + $0xe08] sm:$0xff] }
 0x1a8   :  { %5646 = vmatpush.bf16.msrb.mxu3 %v8778_v3  ;;  %v10409_v25 = vadd.f32 %v5394_v22, %v5382_v21  ;;  %v8797_v21 = vld [vmem:[%s10939_s1 + $0xe88] sm:$0xff] }
 0x1a9   :  { %5620 = vmatpush.bf16.msrb.mxu1 %v8762_v4  ;;  %v5370_v29 = vpop.f32.mrf.mxu1  ;;  %v8805_v22 = vld [vmem:[%s10939_s1 + $0xec8] sm:$0xff] }
 0x1aa   :  { %5608 = vmatpush.bf16.msrb.mxu0 %v8753_v5  ;;  %v8792_v5 = vld [vmem:[%s10939_s1 + $0xe60] sm:$0xff]  ;;  %v8819_v29 = vld [vmem:[%s10939_s1 + $0xf38] sm:$0xff] }
 0x1ab   :  { %5634 = vmatpush.bf16.msrb.mxu2 %v8769_v6  ;;  %v8783_v6 = vld [vmem:[%s10939_s1 + $0xe18] sm:$0xff] }
 0x1ac   :  { %5647 = vmatpush.bf16.msrb.mxu3 %v8777_v7  ;;  %v8799_v7 = vld [vmem:[%s10939_s1 + $0xe98] sm:$0xff] }
 0x1ad   :  { %5621 = vmatpush.bf16.msrb.mxu1 %v8761_v8  ;;  %v5383_v34 = vpop.f32.mrf.mxu2  ;;  %v8807_v8 = vld [vmem:[%s10939_s1 + $0xed8] sm:$0xff] }
 0x1ae   :  { %5609 = vmatpush.bf16.msrb.mxu0 %v8752_v11  ;;  %v5396_v35 = vpop.f32.mrf.mxu3  ;;  %v281_v34 = vpack.c.bf16 %v10471_v50, %v10471_v50  ;;  %v8825_v50 = vld [vmem:[%s10939_s1 + $0xf68] sm:$0xff] }
 0x1af   :  { %5635 = vmatpush.bf16.msrb.mxu2 %v8768_v12  ;;  %v8791_v12 = vld [vmem:[%s10939_s1 + $0xe58] sm:$0xff]  ;;  %v283_v35 = vpack.c.bf16 %v10473_v51, %v10473_v51 }
 0x1b0   :  { %5648 = vmatpush.bf16.msrb.mxu3 %v8776_v13 }
 0x1b1   :  { %5622 = vmatpush.bf16.msrb.mxu1 %v8760_v16  ;;  %v8798_v16 = vld [vmem:[%s10939_s1 + $0xe90] sm:$0xff] }
 0x1b2   :  { %5610 = vmatpush.bf16.msrb.mxu0 %v8751_v17  ;;  %v8806_v17 = vld [vmem:[%s10939_s1 + $0xed0] sm:$0xff] }
 0x1b3   :  { %5636 = vmatpush.bf16.msrb.mxu2 %v8767_v18 }
 0x1b4   :  { %5649 = vmatpush.bf16.msrb.mxu3 %v8775_v19  ;;  %v8790_v19 = vld [vmem:[%s10939_s1 + $0xe50] sm:$0xff] }
 0x1b5   :  { %5623 = vmatpush.bf16.msrb.mxu1 %v8759_v23 }
 0x1b6   :  { %5611 = vmatpush.bf16.msrb.mxu0 %v8750_v26  ;;  %v8780_v26 = vld [vmem:[%s10939_s1 + $0xe00] sm:$0xff] }
 0x1b7   :  { %5637 = vmatpush.bf16.msrb.mxu2 %v8766_v27  ;;  %v8796_v27 = vld [vmem:[%s10939_s1 + $0xe80] sm:$0xff] }
 0x1b8   :  { %5650 = vmatpush.bf16.msrb.mxu3 %v8774_v28  ;;  %v8804_v28 = vld [vmem:[%s10939_s1 + $0xec0] sm:$0xff] }
 0x1b9   :  { %5624 = vmatpush.bf16.msrb.mxu1 %v8758_v30  ;;  %v8835_v30 = vld [vmem:[%s10939_s1 + $0xfb8] sm:$0xff] }
 0x1ba   :  { %5612 = vmatpush.bf16.msrb.mxu0 %v8749_v31  ;;  %v8843_v31 = vld [vmem:[%s10939_s1 + $0xff8] sm:$0xff] }
 0x1bb   :  { %5638 = vmatpush.bf16.msrb.mxu2 %v8765_v32  ;;  %v8788_v32 = vld [vmem:[%s10939_s1 + $0xe40] sm:$0xff] }
 0x1bc   :  { %5651 = vmatpush.bf16.msrb.mxu3 %v8773_v33  ;;  %v38_v33 = vld [vmem:[%s10940_s0 + $0x88] sm:$0xff] }
 0x1bd   :  { %5625 = vmatpush.bf16.msrb.mxu1 %v8757_v36  ;;  %v8827_v36 = vld [vmem:[%s10939_s1 + $0xf78] sm:$0xff] }
 0x1be   :  { %5613 = vmatpush.bf16.msrb.mxu0 %v8748_v37  ;;  %v5407_v62 = vpop.f32.mrf.mxu0  ;;  %v8818_v37 = vld [vmem:[%s10939_s1 + $0xf30] sm:$0xff] }
 0x1bf   :  { %5639 = vmatpush.bf16.msrb.mxu2 %v8764_v38  ;;  %v5408_v63 = vadd.f32 %v5407_v62, %v10409_v25  ;;  %v8789_v25 = vld [vmem:[%s10939_s1 + $0xe48] sm:$0xff]  ;;  %v284_v38 = vpack.c.bf16 %v10479_v54, %v10479_v54  ;;  %v8832_v54 = vld [vmem:[%s10939_s1 + $0xfa0] sm:$0xff] }
 0x1c0   :  { %5652 = vmatpush.bf16.msrb.mxu3 %v8772_v39  ;;  %v10589_v39 = vld.sshfl [vmem:[#allocation1 + $0x20] sm:$0xff pattern:$0x73625140] }
 0x1c1   :  { %5626 = vmatpush.bf16.msrb.mxu1 %v8756_v43  ;;  %5614 = vmatmul.bf16.vlgmr.msrb.gmra.mxu0 %v277_v45  ;;  %v5420_v3 = vpop.f32.mrf.mxu1  ;;  %v10597_v43 = vld.sshfl [vmem:[#allocation1 + $0x38] sm:$0xff pattern:$0x73625140]  ;;  %v8842_v45 = vld [vmem:[%s10939_s1 + $0xff0] sm:$0xff] }
 0x1c2   :  { %5658 = vmatpush.bf16.msra.mxu0 %v8787_v40  ;;  %5640 = vmatmul.bf16.vlgmr.msrb.gmra.mxu2 %v279_v46  ;;  %v5421_v4 = vadd.f32 %v5420_v3, %v5408_v63  ;;  %v10591_v40 = vld.sshfl [vmem:[#allocation1 + $0x30] sm:$0xff pattern:$0x73625140] }
 0x1c3   :  { %5684 = vmatpush.bf16.msra.mxu2 %v8803_v41  ;;  %5653 = vmatmul.bf16.vlgmr.msrb.gmra.mxu3 %v280_v49  ;;  %v282_v41 = vpack.c.bf16 %v10477_v53, %v10477_v53  ;;  %v8826_v46 = vld [vmem:[%s10939_s1 + $0xf70] sm:$0xff]  ;;  %v8841_v49 = vld [vmem:[%s10939_s1 + $0xfe8] sm:$0xff]  ;;  %v8816_v53 = vld [vmem:[%s10939_s1 + $0xf20] sm:$0xff] }
 0x1c4   :  { %5697 = vmatpush.bf16.msra.mxu3 %v8811_v42  ;;  %5627 = vmatmul.bf16.vlgmr.msrb.gmra.mxu1 %v278_v52  ;;  %v10595_v42 = vld.sshfl [vmem:[#allocation1 + $0x28] sm:$0xff pattern:$0x73625140] }
 0x1c5   :  { %5671 = vmatpush.bf16.msra.mxu1 %v8795_v47  ;;  %v5433_v9 = vpop.f32.mrf.mxu2  ;;  %141 = vst [vmem:[#allocation1 + $0x20] ss:$4 sm:$0xff] %v38_v33  ;;  %v8817_v47 = vld [vmem:[%s10939_s1 + $0xf28] sm:$0xff]  ;;  %v8866_v33 = vld [vmem:[%s10939_s1 + $0x10b0] sm:$0xff] }
 0x1c6   :  { %5659 = vmatpush.bf16.msra.mxu0 %v8786_v48  ;;  %v5434_v10 = vadd.f32 %v5433_v9, %v5421_v4  ;;  %v5446_v11 = vpop.f32.mrf.mxu3  ;;  %v5409_v13 = vpop.f32.mrf.mxu0  ;;  %v8833_v48 = vld [vmem:[%s10939_s1 + $0xfa8] sm:$0xff]  ;;  %v8814_v4 = vld [vmem:[%s10939_s1 + $0xf10] sm:$0xff] }
 0x1c7   :  { %5685 = vmatpush.bf16.msra.mxu2 %v8802_v55  ;;  %v8840_v55 = vld [vmem:[%s10939_s1 + $0xfe0] sm:$0xff]  ;;  %v8813_v9 = vld [vmem:[%s10939_s1 + $0xf08] sm:$0xff] }
 0x1c8   :  { %5698 = vmatpush.bf16.msra.mxu3 %v8810_v56  ;;  %v10527_v14 = vadd.f32 %v5446_v11, %v5434_v10  ;;  %v8829_v10 = vld [vmem:[%s10939_s1 + $0xf88] sm:$0xff] }
 0x1c9   :  { %5672 = vmatpush.bf16.msra.mxu1 %v8794_v57  ;;  %v5422_v18 = vpop.f32.mrf.mxu1  ;;  %v8837_v11 = vld [vmem:[%s10939_s1 + $0xfc8] sm:$0xff] }
 0x1ca   :  { %5660 = vmatpush.bf16.msra.mxu0 %v8785_v58  ;;  %v8824_v58 = vld [vmem:[%s10939_s1 + $0xf60] sm:$0xff]  ;;  %v8851_v18 = vld [vmem:[%s10939_s1 + $0x1038] sm:$0xff] }
 0x1cb   :  { %5686 = vmatpush.bf16.msra.mxu2 %v8801_v59  ;;  %v8815_v59 = vld [vmem:[%s10939_s1 + $0xf18] sm:$0xff] }
 0x1cc   :  { %5699 = vmatpush.bf16.msra.mxu3 %v8809_v60  ;;  %v8831_v60 = vld [vmem:[%s10939_s1 + $0xf98] sm:$0xff] }
 0x1cd   :  { %5673 = vmatpush.bf16.msra.mxu1 %v8793_v61  ;;  %v5435_v23 = vpop.f32.mrf.mxu2  ;;  %v8839_v61 = vld [vmem:[%s10939_s1 + $0xfd8] sm:$0xff] }
 0x1ce   :  { %5661 = vmatpush.bf16.msra.mxu0 %v8784_v0  ;;  %v5448_v24 = vpop.f32.mrf.mxu3  ;;  %v285_v23 = vpack.c.bf16 %v10589_v39, %v10589_v39  ;;  %v8857_v39 = vld [vmem:[%s10939_s1 + $0x1068] sm:$0xff] }
 0x1cf   :  { %5687 = vmatpush.bf16.msra.mxu2 %v8800_v1  ;;  %v8823_v1 = vld [vmem:[%s10939_s1 + $0xf58] sm:$0xff]  ;;  %v287_v24 = vpack.c.bf16 %v10591_v40, %v10591_v40 }
 0x1d0   :  { %5700 = vmatpush.bf16.msra.mxu3 %v8808_v2 }
 0x1d1   :  { %5674 = vmatpush.bf16.msra.mxu1 %v8792_v5  ;;  %v8830_v5 = vld [vmem:[%s10939_s1 + $0xf90] sm:$0xff] }
 0x1d2   :  { %5662 = vmatpush.bf16.msra.mxu0 %v8783_v6  ;;  %v8838_v6 = vld [vmem:[%s10939_s1 + $0xfd0] sm:$0xff] }
 0x1d3   :  { %5688 = vmatpush.bf16.msra.mxu2 %v8799_v7 }
 0x1d4   :  { %5701 = vmatpush.bf16.msra.mxu3 %v8807_v8  ;;  %v8822_v8 = vld [vmem:[%s10939_s1 + $0xf50] sm:$0xff] }
 0x1d5   :  { %5675 = vmatpush.bf16.msra.mxu1 %v8791_v12 }
 0x1d6   :  { %5663 = vmatpush.bf16.msra.mxu0 %v8782_v15  ;;  %v8812_v15 = vld [vmem:[%s10939_s1 + $0xf00] sm:$0xff] }
 0x1d7   :  { %5689 = vmatpush.bf16.msra.mxu2 %v8798_v16  ;;  %v8828_v16 = vld [vmem:[%s10939_s1 + $0xf80] sm:$0xff] }
 0x1d8   :  { %5702 = vmatpush.bf16.msra.mxu3 %v8806_v17  ;;  %v8836_v17 = vld [vmem:[%s10939_s1 + $0xfc0] sm:$0xff] }
 0x1d9   :  { %5676 = vmatpush.bf16.msra.mxu1 %v8790_v19  ;;  %v8867_v19 = vld [vmem:[%s10939_s1 + $0x10b8] sm:$0xff] }
 0x1da   :  { %5664 = vmatpush.bf16.msra.mxu0 %v8781_v20  ;;  %v8875_v20 = vld [vmem:[%s10939_s1 + $0x10f8] sm:$0xff] }
 0x1db   :  { %5690 = vmatpush.bf16.msra.mxu2 %v8797_v21  ;;  %v8820_v21 = vld [vmem:[%s10939_s1 + $0xf40] sm:$0xff] }
 0x1dc   :  { %5703 = vmatpush.bf16.msra.mxu3 %v8805_v22  ;;  %v39_v22 = vld [vmem:[%s10940_s0 + $0x90] sm:$0x3] }
 0x1dd   :  { %5677 = vmatpush.bf16.msra.mxu1 %v8789_v25  ;;  %v8859_v25 = vld [vmem:[%s10939_s1 + $0x1078] sm:$0xff] }
 0x1de   :  { %5665 = vmatpush.bf16.msra.mxu0 %v8780_v26  ;;  %v5459_v51 = vpop.f32.mrf.mxu0  ;;  %v8850_v26 = vld [vmem:[%s10939_s1 + $0x1030] sm:$0xff] }
 0x1df   :  { %5691 = vmatpush.bf16.msra.mxu2 %v8796_v27  ;;  %v5460_v52 = vadd.f32 %v5459_v51, %v10527_v14  ;;  %v8821_v14 = vld [vmem:[%s10939_s1 + $0xf48] sm:$0xff]  ;;  %v288_v27 = vpack.c.bf16 %v10597_v43, %v10597_v43  ;;  %v8864_v43 = vld [vmem:[%s10939_s1 + $0x10a0] sm:$0xff] }
 0x1e0   :  { %5704 = vmatpush.bf16.msra.mxu3 %v8804_v28  ;;  %v10707_v28 = vld.sshfl [vmem:[#allocation1] sm:$0xff pattern:$0x73625140] }
 0x1e1   :  { %5678 = vmatpush.bf16.msra.mxu1 %v8788_v32  ;;  %5666 = vmatmul.bf16.vlgmr.msra.gmra.mxu0 %v281_v34  ;;  %v5472_v56 = vpop.f32.mrf.mxu1  ;;  %v10715_v32 = vld.sshfl [vmem:[#allocation1 + $0x18] sm:$0xff pattern:$0x73625140]  ;;  %v8874_v34 = vld [vmem:[%s10939_s1 + $0x10f0] sm:$0xff] }
 0x1e2   :  { %5710 = vmatpush.bf16.msrb.mxu0 %v8819_v29  ;;  %5692 = vmatmul.bf16.vlgmr.msra.gmra.mxu2 %v283_v35  ;;  %v5473_v57 = vadd.f32 %v5472_v56, %v5460_v52  ;;  %v10709_v29 = vld.sshfl [vmem:[#allocation1 + $0x10] sm:$0xff pattern:$0x73625140] }
 0x1e3   :  { %5736 = vmatpush.bf16.msrb.mxu2 %v8835_v30  ;;  %5705 = vmatmul.bf16.vlgmr.msra.gmra.mxu3 %v284_v38  ;;  %v286_v30 = vpack.c.bf16 %v10595_v42, %v10595_v42  ;;  %v8858_v35 = vld [vmem:[%s10939_s1 + $0x1070] sm:$0xff]  ;;  %v8873_v38 = vld [vmem:[%s10939_s1 + $0x10e8] sm:$0xff]  ;;  %v8848_v42 = vld [vmem:[%s10939_s1 + $0x1020] sm:$0xff] }
 0x1e4   :  { %5749 = vmatpush.bf16.msrb.mxu3 %v8843_v31  ;;  %5679 = vmatmul.bf16.vlgmr.msra.gmra.mxu1 %v282_v41  ;;  %v10713_v31 = vld.sshfl [vmem:[#allocation1 + $0x8] sm:$0xff pattern:$0x73625140] }
 0x1e5   :  { %5723 = vmatpush.bf16.msrb.mxu1 %v8827_v36  ;;  %v5485_v62 = vpop.f32.mrf.mxu2  ;;  %150 = vst [vmem:[#allocation1] ss:$4 sm:$0xff] %v39_v22  ;;  %v8849_v36 = vld [vmem:[%s10939_s1 + $0x1028] sm:$0xff] }
 0x1e6   :  { %5711 = vmatpush.bf16.msrb.mxu0 %v8818_v37  ;;  %v5486_v63 = vadd.f32 %v5485_v62, %v5473_v57  ;;  %v5498_v0 = vpop.f32.mrf.mxu3  ;;  %v5461_v2 = vpop.f32.mrf.mxu0  ;;  %v8865_v37 = vld [vmem:[%s10939_s1 + $0x10a8] sm:$0xff]  ;;  %v8846_v57 = vld [vmem:[%s10939_s1 + $0x1010] sm:$0xff] }
 0x1e7   :  { %5737 = vmatpush.bf16.msrb.mxu2 %v8834_v44  ;;  %v8872_v44 = vld [vmem:[%s10939_s1 + $0x10e0] sm:$0xff]  ;;  %v8845_v62 = vld [vmem:[%s10939_s1 + $0x1008] sm:$0xff] }
 0x1e8   :  { %5750 = vmatpush.bf16.msrb.mxu3 %v8842_v45  ;;  %v10645_v3 = vadd.f32 %v5498_v0, %v5486_v63  ;;  %v8861_v63 = vld [vmem:[%s10939_s1 + $0x1088] sm:$0xff] }
 0x1e9   :  { %5724 = vmatpush.bf16.msrb.mxu1 %v8826_v46  ;;  %v5474_v7 = vpop.f32.mrf.mxu1  ;;  %v8869_v0 = vld [vmem:[%s10939_s1 + $0x10c8] sm:$0xff] }
 0x1ea   :  { %5712 = vmatpush.bf16.msrb.mxu0 %v8817_v47  ;;  %v8856_v47 = vld [vmem:[%s10939_s1 + $0x1060] sm:$0xff]  ;;  %v8883_v7 = vld [vmem:[%s10939_s1 + $0x1138] sm:$0xff]  ;;  %v8905_v22 = vld [vmem:[%s10939_s1 + $0x11e8] sm:$0xff] }
 0x1eb   :  { %5738 = vmatpush.bf16.msrb.mxu2 %v8833_v48  ;;  %v8847_v48 = vld [vmem:[%s10939_s1 + $0x1018] sm:$0xff] }
 0x1ec   :  { %5751 = vmatpush.bf16.msrb.mxu3 %v8841_v49  ;;  %v8863_v49 = vld [vmem:[%s10939_s1 + $0x1098] sm:$0xff] }
 0x1ed   :  { %5725 = vmatpush.bf16.msrb.mxu1 %v8825_v50  ;;  %v5487_v12 = vpop.f32.mrf.mxu2  ;;  %v8871_v50 = vld [vmem:[%s10939_s1 + $0x10d8] sm:$0xff] }
 0x1ee   :  { %5713 = vmatpush.bf16.msrb.mxu0 %v8816_v53  ;;  %v5500_v13 = vpop.f32.mrf.mxu3  ;;  %v291_v12 = vpack.c.bf16 %v10709_v29, %v10709_v29 }
 0x1ef   :  { %5739 = vmatpush.bf16.msrb.mxu2 %v8832_v54  ;;  %v8855_v54 = vld [vmem:[%s10939_s1 + $0x1058] sm:$0xff] }
 0x1f0   :  { %5752 = vmatpush.bf16.msrb.mxu3 %v8840_v55  ;;  %v8891_v13 = vld [vmem:[%s10939_s1 + $0x1178] sm:$0xff] }
 0x1f1   :  { %5726 = vmatpush.bf16.msrb.mxu1 %v8824_v58  ;;  %v8862_v58 = vld [vmem:[%s10939_s1 + $0x1090] sm:$0xff] }
 0x1f2   :  { %5714 = vmatpush.bf16.msrb.mxu0 %v8815_v59  ;;  %v8870_v59 = vld [vmem:[%s10939_s1 + $0x10d0] sm:$0xff] }
 0x1f3   :  { %5740 = vmatpush.bf16.msrb.mxu2 %v8831_v60 }
 0x1f4   :  { %5753 = vmatpush.bf16.msrb.mxu3 %v8839_v61  ;;  %v8854_v61 = vld [vmem:[%s10939_s1 + $0x1050] sm:$0xff] }
 0x1f5   :  { %5727 = vmatpush.bf16.msrb.mxu1 %v8823_v1 }
 0x1f6   :  { %5715 = vmatpush.bf16.msrb.mxu0 %v8814_v4  ;;  %v8844_v4 = vld [vmem:[%s10939_s1 + $0x1000] sm:$0xff] }
 0x1f7   :  { %5741 = vmatpush.bf16.msrb.mxu2 %v8830_v5  ;;  %v8860_v5 = vld [vmem:[%s10939_s1 + $0x1080] sm:$0xff] }
 0x1f8   :  { %5754 = vmatpush.bf16.msrb.mxu3 %v8838_v6  ;;  %v8868_v6 = vld [vmem:[%s10939_s1 + $0x10c0] sm:$0xff] }
 0x1f9   :  { %5728 = vmatpush.bf16.msrb.mxu1 %v8822_v8  ;;  %v8899_v8 = vld [vmem:[%s10939_s1 + $0x11b8] sm:$0xff] }
 0x1fa   :  { %5716 = vmatpush.bf16.msrb.mxu0 %v8813_v9  ;;  %v8907_v9 = vld [vmem:[%s10939_s1 + $0x11f8] sm:$0xff] }
 0x1fb   :  { %5742 = vmatpush.bf16.msrb.mxu2 %v8829_v10  ;;  %v8852_v10 = vld [vmem:[%s10939_s1 + $0x1040] sm:$0xff] }
 0x1fc   :  { %5755 = vmatpush.bf16.msrb.mxu3 %v8837_v11  ;;  %v289_v11 = vpack.c.bf16 %v10707_v28, %v10707_v28  ;;  %v8904_v28 = vld [vmem:[%s10939_s1 + $0x11e0] sm:$0xff] }
 0x1fd   :  { %5729 = vmatpush.bf16.msrb.mxu1 %v8821_v14  ;;  %v292_v14 = vpack.c.bf16 %v10715_v32, %v10715_v32  ;;  %v8879_v32 = vld [vmem:[%s10939_s1 + $0x1118] sm:$0xff] }
 0x1fe   :  { %5717 = vmatpush.bf16.msrb.mxu0 %v8812_v15  ;;  %v5511_v40 = vpop.f32.mrf.mxu0  ;;  %v290_v15 = vpack.c.bf16 %v10713_v31, %v10713_v31  ;;  %v8888_v31 = vld [vmem:[%s10939_s1 + $0x1160] sm:$0xff] }
 0x1ff   :  { %5743 = vmatpush.bf16.msrb.mxu2 %v8828_v16  ;;  %v5512_v41 = vadd.f32 %v5511_v40, %v10645_v3  ;;  %v8853_v3 = vld [vmem:[%s10939_s1 + $0x1048] sm:$0xff]  ;;  %v8882_v16 = vld [vmem:[%s10939_s1 + $0x1130] sm:$0xff] }
 0x200   :  { %5756 = vmatpush.bf16.msrb.mxu3 %v8836_v17  ;;  %v8898_v17 = vld [vmem:[%s10939_s1 + $0x11b0] sm:$0xff] }
 0x201   :  { %5730 = vmatpush.bf16.msrb.mxu1 %v8820_v21  ;;  %5718 = vmatmul.bf16.vlgmr.msrb.gmra.mxu0 %v285_v23  ;;  %v5524_v45 = vpop.f32.mrf.mxu1  ;;  %v8897_v21 = vld [vmem:[%s10939_s1 + $0x11a8] sm:$0xff] }
 0x202   :  { %5762 = vmatpush.bf16.msra.mxu0 %v8851_v18  ;;  %5744 = vmatmul.bf16.vlgmr.msrb.gmra.mxu2 %v287_v24  ;;  %v5525_v46 = vadd.f32 %v5524_v45, %v5512_v41  ;;  %v8906_v18 = vld [vmem:[%s10939_s1 + $0x11f0] sm:$0xff]  ;;  %v8889_v23 = vld [vmem:[%s10939_s1 + $0x1168] sm:$0xff] }
 0x203   :  { %5788 = vmatpush.bf16.msra.mxu2 %v8867_v19  ;;  %5757 = vmatmul.bf16.vlgmr.msrb.gmra.mxu3 %v288_v27  ;;  %v8890_v19 = vld [vmem:[%s10939_s1 + $0x1170] sm:$0xff]  ;;  %v8896_v27 = vld [vmem:[%s10939_s1 + $0x11a0] sm:$0xff] }
 0x204   :  { %5801 = vmatpush.bf16.msra.mxu3 %v8875_v20  ;;  %5731 = vmatmul.bf16.vlgmr.msrb.gmra.mxu1 %v286_v30  ;;  %v8881_v20 = vld [vmem:[%s10939_s1 + $0x1128] sm:$0xff]  ;;  %v8878_v41 = vld [vmem:[%s10939_s1 + $0x1110] sm:$0xff] }
 0x205   :  { %5775 = vmatpush.bf16.msra.mxu1 %v8859_v25  ;;  %v5537_v51 = vpop.f32.mrf.mxu2  ;;  %v8886_v45 = vld [vmem:[%s10939_s1 + $0x1150] sm:$0xff] }
 0x206   :  { %5763 = vmatpush.bf16.msra.mxu0 %v8850_v26  ;;  %v5538_v52 = vadd.f32 %v5537_v51, %v5525_v46  ;;  %v5550_v53 = vpop.f32.mrf.mxu3  ;;  %v5513_v55 = vpop.f32.mrf.mxu0  ;;  %v8880_v26 = vld [vmem:[%s10939_s1 + $0x1120] sm:$0xff]  ;;  %v8877_v46 = vld [vmem:[%s10939_s1 + $0x1108] sm:$0xff] }
 0x207   :  { %5789 = vmatpush.bf16.msra.mxu2 %v8866_v33  ;;  %v8895_v33 = vld [vmem:[%s10939_s1 + $0x1198] sm:$0xff]  ;;  %v8885_v51 = vld [vmem:[%s10939_s1 + $0x1148] sm:$0xff]  ;;  %v146_v55 = vld.sshfl [vmem:[#allocation1 + $0x20] sm:$0xff pattern:$0x73625140] }
 0x208   :  { %5802 = vmatpush.bf16.msra.mxu3 %v8874_v34  ;;  %v5551_v56 = vadd.f32 %v5550_v53, %v5538_v52  ;;  %v8903_v34 = vld [vmem:[%s10939_s1 + $0x11d8] sm:$0xff]  ;;  %v8876_v52 = vld [vmem:[%s10939_s1 + $0x1100] sm:$0xff] }
 0x209   :  { %5776 = vmatpush.bf16.msra.mxu1 %v8858_v35  ;;  %v5526_v60 = vpop.f32.mrf.mxu1  ;;  %v8892_v53 = vld [vmem:[%s10939_s1 + $0x1180] sm:$0xff] }
 0x20a   :  { %5764 = vmatpush.bf16.msra.mxu0 %v8849_v36  ;;  %v293_v60 = vpack.c.bf16 %v146_v55, %v146_v55 }
 0x20b   :  { %5790 = vmatpush.bf16.msra.mxu2 %v8865_v37 }
 0x20c   :  { %5803 = vmatpush.bf16.msra.mxu3 %v8873_v38  ;;  %v8887_v38 = vld [vmem:[%s10939_s1 + $0x1158] sm:$0xff] }
 0x20d   :  { %5777 = vmatpush.bf16.msra.mxu1 %v8857_v39  ;;  %v5539_v1 = vpop.f32.mrf.mxu2 }
 0x20e   :  { %5765 = vmatpush.bf16.msra.mxu0 %v8848_v42  ;;  %v5552_v2 = vpop.f32.mrf.mxu3  ;;  %v8894_v42 = vld [vmem:[%s10939_s1 + $0x1190] sm:$0xff]  ;;  %v8908_v1 = vld [vmem:[%s10939_s1 + $0x1200] sm:$0xff] }
 0x20f   :  { %5791 = vmatpush.bf16.msra.mxu2 %v8864_v43  ;;  %v8902_v43 = vld [vmem:[%s10939_s1 + $0x11d0] sm:$0xff] }
 0x210   :  { %5804 = vmatpush.bf16.msra.mxu3 %v8872_v44 }
 0x211   :  { %5778 = vmatpush.bf16.msra.mxu1 %v8856_v47  ;;  %v8893_v47 = vld [vmem:[%s10939_s1 + $0x1188] sm:$0xff] }
 0x212   :  { %5766 = vmatpush.bf16.msra.mxu0 %v8847_v48  ;;  %v8901_v48 = vld [vmem:[%s10939_s1 + $0x11c8] sm:$0xff] }
 0x213   :  { %5792 = vmatpush.bf16.msra.mxu2 %v8863_v49 }
 0x214   :  { %5805 = vmatpush.bf16.msra.mxu3 %v8871_v50 }
 0x215   :  { %5779 = vmatpush.bf16.msra.mxu1 %v8855_v54  ;;  %v8900_v54 = vld [vmem:[%s10939_s1 + $0x11c0] sm:$0xff] }
 0x216   :  { %5767 = vmatpush.bf16.msra.mxu0 %v8846_v57  ;;  %v149_v57 = vld.sshfl [vmem:[#allocation1 + $0x38] sm:$0xff pattern:$0x73625140] }
 0x217   :  { %5793 = vmatpush.bf16.msra.mxu2 %v8862_v58  ;;  %v8909_v58 = vld [vmem:[%s10939_s1 + $0x1208] sm:$0xff] }
 0x218   :  { %5806 = vmatpush.bf16.msra.mxu3 %v8870_v59  ;;  %v8884_v59 = vld [vmem:[%s10939_s1 + $0x1140] sm:$0xff] }
 0x219   :  { %5780 = vmatpush.bf16.msra.mxu1 %v8854_v61  ;;  %v147_v61 = vld.sshfl [vmem:[#allocation1 + $0x28] sm:$0xff pattern:$0x73625140] }
 0x21a   :  { %5768 = vmatpush.bf16.msra.mxu0 %v8845_v62 }
 0x21b   :  { %5794 = vmatpush.bf16.msra.mxu2 %v8861_v63  ;;  %v296_v63 = vpack.c.bf16 %v149_v57, %v149_v57 }
 0x21c   :  { %5807 = vmatpush.bf16.msra.mxu3 %v8869_v0  ;;  %v294_v0 = vpack.c.bf16 %v147_v61, %v147_v61 }
 0x21d   :  { %5781 = vmatpush.bf16.msra.mxu1 %v8853_v3 }
 0x21e   :  { %5769 = vmatpush.bf16.msra.mxu0 %v8844_v4  ;;  %v5563_v24 = vpop.f32.mrf.mxu0 }
 0x21f   :  { %5795 = vmatpush.bf16.msra.mxu2 %v8860_v5  ;;  %v5564_v25 = vadd.f32 %v5563_v24, %v5551_v56  ;;  %v148_v56 = vld.sshfl [vmem:[#allocation1 + $0x30] sm:$0xff pattern:$0x73625140] }
 0x220   :  { %5808 = vmatpush.bf16.msra.mxu3 %v8868_v6  ;;  %v295_v62 = vpack.c.bf16 %v148_v56, %v148_v56  ;;  %v151_v6 = vld.sshfl [vmem:[#allocation1] sm:$0xff pattern:$0x73625140] }
 0x221   :  { %5782 = vmatpush.bf16.msra.mxu1 %v8852_v10  ;;  %5770 = vmatmul.bf16.vlgmr.msra.gmra.mxu0 %v289_v11  ;;  %v5576_v29 = vpop.f32.mrf.mxu1 }
 0x222   :  { %5814 = vmatpush.bf16.msrb.mxu0 %v8883_v7  ;;  %5796 = vmatmul.bf16.vlgmr.msra.gmra.mxu2 %v291_v12  ;;  %v5577_v30 = vadd.f32 %v5576_v29, %v5564_v25 }
 0x223   :  { %5840 = vmatpush.bf16.msrb.mxu2 %v8899_v8  ;;  %5809 = vmatmul.bf16.vlgmr.msra.gmra.mxu3 %v292_v14  ;;  %v297_v8 = vpack.c.bf16 %v151_v6, %v151_v6 }
 0x224   :  { %5853 = vmatpush.bf16.msrb.mxu3 %v8907_v9  ;;  %5783 = vmatmul.bf16.vlgmr.msra.gmra.mxu1 %v290_v15 }
 0x225   :  { %5827 = vmatpush.bf16.msrb.mxu1 %v8891_v13  ;;  %v5589_v35 = vpop.f32.mrf.mxu2 }
 0x226   :  { %5815 = vmatpush.bf16.msrb.mxu0 %v8882_v16  ;;  %v5590_v36 = vadd.f32 %v5589_v35, %v5577_v30  ;;  %v5602_v37 = vpop.f32.mrf.mxu3  ;;  %v5565_v39 = vpop.f32.mrf.mxu0  ;;  %v8916_v35 = vld [vmem:[%s10943_s3 + $0x30] sm:$0xff] }
 0x227   :  { %5841 = vmatpush.bf16.msrb.mxu2 %v8898_v17 }
 0x228   :  { %5854 = vmatpush.bf16.msrb.mxu3 %v8906_v18  ;;  %v5603_v40 = vadd.f32 %v5602_v37, %v5590_v36 }
 0x229   :  { %5828 = vmatpush.bf16.msrb.mxu1 %v8890_v19  ;;  %v5578_v44 = vpop.f32.mrf.mxu1 }
 0x22a   :  { %5816 = vmatpush.bf16.msrb.mxu0 %v8881_v20 }
 0x22b   :  { %5842 = vmatpush.bf16.msrb.mxu2 %v8897_v21 }
 0x22c   :  { %5855 = vmatpush.bf16.msrb.mxu3 %v8905_v22 }
 0x22d   :  { %5829 = vmatpush.bf16.msrb.mxu1 %v8889_v23  ;;  %v5591_v49 = vpop.f32.mrf.mxu2 }
 0x22e   :  { %5817 = vmatpush.bf16.msrb.mxu0 %v8880_v26  ;;  %v5604_v50 = vpop.f32.mrf.mxu3  ;;  %v8911_v49 = vld [vmem:[%s10943_s3 + $0x8] sm:$0xff] }
 0x22f   :  { %5843 = vmatpush.bf16.msrb.mxu2 %v8896_v27 }
 0x230   :  { %5856 = vmatpush.bf16.msrb.mxu3 %v8904_v28 }
 0x231   :  { %5830 = vmatpush.bf16.msrb.mxu1 %v8888_v31 }
 0x232   :  { %5818 = vmatpush.bf16.msrb.mxu0 %v8879_v32  ;;  %v8917_v32 = vld [vmem:[%s10943_s3 + $0x38] sm:$0xff] }
 0x233   :  { %5844 = vmatpush.bf16.msrb.mxu2 %v8895_v33 }
 0x234   :  { %5857 = vmatpush.bf16.msrb.mxu3 %v8903_v34 }
 0x235   :  { %5831 = vmatpush.bf16.msrb.mxu1 %v8887_v38  ;;  %v8915_v38 = vld [vmem:[%s10943_s3 + $0x28] sm:$0xff] }
 0x236   :  { %5819 = vmatpush.bf16.msrb.mxu0 %v8878_v41 }
 0x237   :  { %5845 = vmatpush.bf16.msrb.mxu2 %v8894_v42  ;;  %v8913_v42 = vld [vmem:[%s10943_s3 + $0x18] sm:$0xff] }
 0x238   :  { %5858 = vmatpush.bf16.msrb.mxu3 %v8902_v43 }
 0x239   :  { %5832 = vmatpush.bf16.msrb.mxu1 %v8886_v45 }
 0x23a   :  { %5820 = vmatpush.bf16.msrb.mxu0 %v8877_v46  ;;  %v8912_v46 = vld [vmem:[%s10943_s3 + $0x10] sm:$0xff] }
 0x23b   :  { %5846 = vmatpush.bf16.msrb.mxu2 %v8893_v47 }
 0x23c   :  { %5859 = vmatpush.bf16.msrb.mxu3 %v8901_v48 }
 0x23d   :  { %5833 = vmatpush.bf16.msrb.mxu1 %v8885_v51 }
 0x23e   :  { %5821 = vmatpush.bf16.msrb.mxu0 %v8876_v52  ;;  %v5615_v2 = vpop.f32.mrf.mxu0 }
 0x23f   :  { %5847 = vmatpush.bf16.msrb.mxu2 %v8892_v53  ;;  %v5616_v3 = vadd.f32 %v5615_v2, %v5603_v40  ;;  %v8914_v40 = vld [vmem:[%s10943_s3 + $0x20] sm:$0xff] }
 0x240   :  { %5860 = vmatpush.bf16.msrb.mxu3 %v8900_v54  ;;  %v8910_v54 = vld [vmem:[%s10943_s3] sm:$0xff] }
 0x241   :  { %5834 = vmatpush.bf16.msrb.mxu1 %v8884_v59  ;;  %5822 = vmatmul.bf16.vlgmr.msrb.gmra.mxu0 %v293_v60  ;;  %v5628_v4 = vpop.f32.mrf.mxu1 }
 0x242   :  { %5872 = vmatpush.bf16.msra.mxu0 %v8909_v58  ;;  %5848 = vmatmul.bf16.vlgmr.msrb.gmra.mxu2 %v295_v62  ;;  %v5629_v5 = vadd.f32 %v5628_v4, %v5616_v3 }
 0x243   :  { %5861 = vmatmul.bf16.vlgmr.msrb.gmra.mxu3 %v296_v63 }
 0x244   :  { %5835 = vmatmul.bf16.vlgmr.msrb.gmra.mxu1 %v294_v0 }
 0x245   :  { %v5641_v7 = vpop.f32.mrf.mxu2  ;;  %5949 = vmatpush.bf16.msra.mxu1 %v8917_v32 }
 0x246   :  { %5873 = vmatpush.bf16.msra.mxu0 %v8908_v1  ;;  %v5642_v9 = vadd.f32 %v5641_v7, %v5629_v5  ;;  %v5654_v10 = vpop.f32.mrf.mxu3  ;;  %v5617_v11 = vpop.f32.mrf.mxu0 }
 0x248   :  { %v5655_v12 = vadd.f32 %v5654_v10, %v5642_v9 }
 0x249   :  { %v5630_v13 = vpop.f32.mrf.mxu1  ;;  %5950 = vmatpush.bf16.msra.mxu1 %v8916_v35 }
 0x24a   :  { %v5962_v13 = vlaneseq }
 0x24d   :  { %v5643_v14 = vpop.f32.mrf.mxu2  ;;  %5951 = vmatpush.bf16.msra.mxu1 %v8915_v38 }
 0x24e   :  { %v5656_v15 = vpop.f32.mrf.mxu3  ;;  %v5963_v14 = vand.u32 127, %v5962_v13 }
 0x24f   :  { %v8919_v15 = vld [vmem:[%s10942_s4] ss:$0 sm:$0xff] }
 0x250   :  { %vm5964_vm1 = vcmp.ge.s32.totalorder %v5963_v14, 1  ;;  %vm5965_vm2 = vcmp.lt.s32.totalorder %v5963_v14, 5  ;;  %vm5980_vm5 = vcmp.eq.s32.totalorder %v5963_v14, 0 }
 0x251   :  { %8299 = vmatmul.msk.bf16.vlgmr.msra.gmra.mxu0 %vm4926_vm0, %v297_v8  ;;  %5952 = vmatpush.bf16.msra.mxu1 %v8914_v40  ;;  %vm5966_vm3 = vmand %vm5964_vm1, %vm5965_vm2 }
 0x255   :  { %5953 = vmatpush.bf16.msra.mxu1 %v8913_v42 }
 0x259   :  { %5954 = vmatpush.bf16.msra.mxu1 %v8912_v46 }
 0x25d   :  { %5955 = vmatpush.bf16.msra.mxu1 %v8911_v49 }
 0x25e   :  { %v5667_v16 = vpop.f32.mrf.mxu0 }
 0x25f   :  { %v5668_v17 = vadd.f32 %v5667_v16, %v5655_v12 }
 0x261   :  { %v5680_v18 = vpop.f32.mrf.mxu1  ;;  %5956 = vmatpush.bf16.msra.mxu1 %v8910_v54 }
 0x262   :  { %v5681_v19 = vadd.f32 %v5680_v18, %v5668_v17 }
 0x265   :  { %v5693_v20 = vpop.f32.mrf.mxu2 }
 0x266   :  { %v5694_v21 = vadd.f32 %v5693_v20, %v5681_v19  ;;  %v5706_v22 = vpop.f32.mrf.mxu3  ;;  %v5669_v23 = vpop.f32.mrf.mxu0 }
 0x268   :  { %v5707_v24 = vadd.f32 %v5706_v22, %v5694_v21 }
 0x269   :  { %v5682_v25 = vpop.f32.mrf.mxu1 }
 0x26d   :  { %v5695_v26 = vpop.f32.mrf.mxu2 }
 0x26e   :  { %v5708_v27 = vpop.f32.mrf.mxu3 }
 0x27e   :  { %v5719_v28 = vpop.f32.mrf.mxu0 }
 0x27f   :  { %v5720_v47 = vadd.f32 %v5719_v28, %v5707_v24 }
 0x281   :  { %v5732_v29 = vpop.f32.mrf.mxu1 }
 0x282   :  { %v5733_v50 = vadd.f32 %v5732_v29, %v5720_v47 }
 0x285   :  { %v5745_v30 = vpop.f32.mrf.mxu2 }
 0x286   :  { %v5758_v31 = vpop.f32.mrf.mxu3  ;;  %v5721_v33 = vpop.f32.mrf.mxu0  ;;  %v5746_v53 = vadd.f32 %v5745_v30, %v5733_v50 }
 0x288   :  { %v5759_v55 = vadd.f32 %v5758_v31, %v5746_v53 }
 0x289   :  { %v5734_v34 = vpop.f32.mrf.mxu1 }
 0x28d   :  { %v5747_v36 = vpop.f32.mrf.mxu2 }
 0x28e   :  { %v5760_v37 = vpop.f32.mrf.mxu3 }
 0x29e   :  { %v5771_v39 = vpop.f32.mrf.mxu0 }
 0x29f   :  { %v5772_v56 = vadd.f32 %v5771_v39, %v5759_v55 }
 0x2a1   :  { %v5784_v41 = vpop.f32.mrf.mxu1 }
 0x2a2   :  { %v5785_v57 = vadd.f32 %v5784_v41, %v5772_v56 }
 0x2a5   :  { %v5797_v43 = vpop.f32.mrf.mxu2 }
 0x2a6   :  { %v5810_v44 = vpop.f32.mrf.mxu3  ;;  %v5773_v45 = vpop.f32.mrf.mxu0  ;;  %v5798_v58 = vadd.f32 %v5797_v43, %v5785_v57 }
 0x2a8   :  { %v5811_v60 = vadd.f32 %v5810_v44, %v5798_v58 }
 0x2a9   :  { %v5786_v48 = vpop.f32.mrf.mxu1 }
 0x2ad   :  { %v5799_v51 = vpop.f32.mrf.mxu2 }
 0x2ae   :  { %v5812_v52 = vpop.f32.mrf.mxu3 }
 0x2be   :  { %v5823_v59 = vpop.f32.mrf.mxu0 }
 0x2bf   :  { %v5824_v62 = vadd.f32 %v5823_v59, %v5811_v60 }
 0x2c1   :  { %v5836_v61 = vpop.f32.mrf.mxu1 }
 0x2c2   :  { %v5837_v2 = vadd.f32 %v5836_v61, %v5824_v62 }
 0x2c5   :  { %v5849_v63 = vpop.f32.mrf.mxu2 }
 0x2c6   :  { %v5862_v0 = vpop.f32.mrf.mxu3  ;;  %v5825_v1 = vpop.f32.mrf.mxu0  ;;  %v5850_v3 = vadd.f32 %v5849_v63, %v5837_v2 }
 0x2c8   :  { %v5863_v5 = vadd.f32 %v5862_v0, %v5850_v3 }
 0x2c9   :  { %v5838_v4 = vpop.f32.mrf.mxu1 }
 0x2cd   :  { %v5851_v6 = vpop.f32.mrf.mxu2 }
 0x2ce   :  { %v5864_v7 = vpop.f32.mrf.mxu3  ;;  %v5875_v8 = vpop.f32.mrf.mxu0 }
 0x2cf   :  { %v5876_v9 = vadd.f32 %v5875_v8, %v5863_v5 }
 0x2d1   :  { %v5879_v10 = vmax.f32 %v5876_v9, 0.0 }
 0x2d3   :  { %v5880_v11 = vpack.c.bf16 %v5879_v10, %v5879_v10 }
 0x2d5   :  { %5957 = vmatmul.bf16.vlgmr.msra.gmra.mxu1 %v5880_v11 }
 0x2d6   :  { %v5877_v12 = vpop.f32.mrf.mxu0 }
 0x352   :  { %v5958_v16 = vpop.f32.mrf.mxu1 }
 0x353   :  { %v5959_v17 = vadd.f32 %v8919_v15, %v5958_v16 }
 0x355   :  { %v5967_v18 = vsel %vm5966_vm3, %v5959_v17, -1e+30 }
 0x356   :  { %v5969_v19 = vsel %vm5968_vm4, %v5967_v18, -inf }
 0x357   :  { %5970 = vmax.xlane.f32.xlu0 %v5969_v19 }
 0x35a   :  { %v5960_v20 = vpop.f32.mrf.mxu1 }
 0x3ca   :  { %v5971_v21 = vpop.xlane.xlu0 %5970 }
 0x3cb   :  { %v5972_v22 = vsub.f32 %v5967_v18, %v5971_v21 }
 0x3cd   :  { %v5973_v23 = vmul.f32 1.442695, %v5972_v22 }
 0x3cf   :  { %8920 = vpow2.f32 %v5973_v23 }
 0x3d5   :  { %v8921_v24 = vpop.eup %8920 }
 0x3d6   :  { %v5975_v25 = vsel %vm5968_vm4, %v8921_v24, 0.0 }
 0x3d7   :  { %5976 = vadd.xlane.f32.xlu0 %v5975_v25 }
 0x44a   :  { %v5977_v26 = vpop.xlane.xlu0 %5976 }
 0x44b   :  { %8922 = vrcp.f32 %v5977_v26 }
 0x451   :  { %v8923_v27 = vpop.eup %8922 }
 0x452   :  { %v5979_v28 = vmul.f32 %v8923_v27, %v8921_v24 }
 0x454   :  { %v5981_v29 = vsel %vm5980_vm5, %v5959_v17, %v5979_v28 }
 0x455   :  { %5982 = vst [vmem:[%s10944_s5] sm:$0x3] %v5981_v29 }

</bundles_post_ra>
